<compile_context>
chip_gen: v7x
topology: tpu7x:2x2x1
jax: 0.10.0
libtpu: 0.0.40
codegen_flags: <defaults>
</compile_context>

<pallas_src>
import functools

import jax
import jax.numpy as jnp
from jax import lax
from jax.experimental import pallas as pl
from jax.experimental.pallas import tpu as pltpu


# ---------------------------------------------------------------------------
# Fused kernel: linear + PosAttention + residual + ResNet_Block FFN
# ---------------------------------------------------------------------------
def _group_attention_kernel(x_ref, emap_ref, eattr_ref,
                            wlin_ref, wr_ref, br_ref,
                            wl1_ref, bl1_ref, wl2_ref, bl2_ref,
                            o_ref, *, batch, n, temperature, matmul_dtype):
    b, nn_ = batch, n
    x2d = x_ref[...]                                     # (B*N, Cin) f32
    cin = x2d.shape[-1]
    inv_temp = 1.0 / temperature

    def mm(a, w):                                        # MXU matmul, f32 accumulate
        return jnp.dot(a.astype(matmul_dtype), w.astype(matmul_dtype),
                       preferred_element_type=jnp.float32)

    # ---- linear (1x1 conv, no bias): feat = x @ W^T ------------------------
    feat2d = mm(x2d, wlin_ref[...])                      # (B*N, Cin)
    feat = feat2d.reshape(b, nn_, cin)                   # (B, N, C)

    # v = ELU(feat)  (alpha = 1)
    v2d = jnp.where(feat2d > 0.0, feat2d,
                    jnp.exp(jnp.minimum(feat2d, 0.0)) - 1.0)
    v = v2d.reshape(b, nn_, cin)

    # ---- PosAttention -------------------------------------------------------
    feat_mx = feat.astype(matmul_dtype)
    logits = jnp.einsum('bnc,bmc->bnm', feat_mx, feat_mx,
                        preferred_element_type=jnp.float32) * inv_temp
    logits = eattr_ref[...] * logits                     # (B, N, N)

    # masked softmax (mask applied to logits before exp -> no transient inf;
    # fully-masked rows come out all-zero, matching torch's masked_fill).
    mask = emap_ref[...] != 0.0
    masked = jnp.where(mask, logits, -1e30)
    mrow = jnp.max(masked, axis=-1, keepdims=True)
    e = jnp.where(mask, jnp.exp(masked - mrow), 0.0)
    s = jnp.sum(e, axis=-1, keepdims=True)
    attn = e * pl.reciprocal(jnp.where(s > 0.0, s, 1.0), approx=True)

    # val[b,n,c] = sum_m attn[b,n,m] * v[b,m,c]
    val = jnp.einsum('bnm,bmc->bnc', attn.astype(matmul_dtype),
                     v.astype(matmul_dtype),
                     preferred_element_type=jnp.float32)  # (B, N, C)

    # InstanceNorm2d on a (B, 1, N, C) map: single channel -> normalize per
    # batch over all N*C elements (eps=1e-5, no affine).
    mu = jnp.mean(jnp.mean(val, axis=2, keepdims=True), axis=1, keepdims=True)
    d = val - mu
    var = jnp.mean(jnp.mean(d * d, axis=2, keepdims=True), axis=1, keepdims=True)
    val = d * lax.rsqrt(var + 1e-5)

    # feat_attn = attn.transpose(1,3) + x   (both already node-major (B*N, C))
    h0 = val.reshape(b * nn_, cin) + x2d

    # ---- ResNet_Block FFN ---------------------------------------------------
    def batchnorm(y):                                    # BatchNorm2d (training)
        m_ = jnp.mean(y, axis=0, keepdims=True)
        d_ = y - m_
        v_ = jnp.mean(d_ * d_, axis=0, keepdims=True)
        return d_ * lax.rsqrt(v_ + 1e-5)

    def instnorm(y):                                     # InstanceNorm2d per (b, c)
        c = y.shape[-1]
        y3 = y.reshape(b, nn_, c)
        m_ = jnp.mean(y3, axis=1, keepdims=True)
        d_ = y3 - m_
        v_ = jnp.mean(d_ * d_, axis=1, keepdims=True)
        return (d_ * lax.rsqrt(v_ + 1e-5)).reshape(b * nn_, c)

    # right branch: conv1x1 -> BN
    right = batchnorm(mm(h0, wr_ref[...]) + br_ref[...])

    # left branch: conv1x1 -> IN -> BN -> ReLU -> conv1x1 -> IN -> BN
    left = mm(h0, wl1_ref[...]) + bl1_ref[...]
    left = jnp.maximum(batchnorm(instnorm(left)), 0.0)
    left = mm(left, wl2_ref[...]) + bl2_ref[...]
    left = batchnorm(instnorm(left))

    o_ref[...] = jnp.maximum(left + right, 0.0).astype(o_ref.dtype)


# ---------------------------------------------------------------------------
# Wrapper
# ---------------------------------------------------------------------------
def group_attention_forward(x, edge_map, edge_attr, params,
                            *, matmul_dtype=jnp.bfloat16):
    B, C, N, _ = x.shape
    Cout = params["w_r"].shape[1]
    temperature = float(C) ** 0.5

    # NCHW (B, C, N, 1) -> node-major (B*N, C): channels ride the lane axis.
    # Layout plumbing only, done once on the (tiny) input.
    x2d = x[..., 0].transpose(0, 2, 1).reshape(B * N, C)
    em = edge_map.astype(jnp.float32)
    ea = edge_attr.astype(jnp.float32)

    def full_spec(shape):
        nd = len(shape)
        return pl.BlockSpec(shape, lambda i, _nd=nd: (0,) * _nd)

    operands = (x2d, em, ea,
                params["w_lin"], params["w_r"], params["b_r"],
                params["w_l1"], params["b_l1"], params["w_l2"], params["b_l2"])

    # TODO(synk): for v7x's two TensorCores, split BatchNorm into a stats pass +
    # apply pass so a 'parallel' row-block grid axis can shard the FFN; at these
    # toy sizes a single fused invocation beats two launches.
    # TODO(synk): if N is scaled up, tile the key axis flash-style (online
    # softmax) instead of holding full (N, N) logits in VMEM.
    out2d = pl.pallas_call(
        functools.partial(_group_attention_kernel, batch=B, n=N,
                          temperature=temperature, matmul_dtype=matmul_dtype),
        out_shape=jax.ShapeDtypeStruct((B * N, Cout), jnp.float32),
        grid=(1,),
        in_specs=[full_spec(op.shape) for op in operands],
        out_specs=full_spec((B * N, Cout)),
        compiler_params=pltpu.CompilerParams(
            dimension_semantics=("arbitrary",),
            vmem_limit_bytes=32 * 1024 * 1024,
        ),
    )(*operands)

    x_out = out2d.reshape(B, N, Cout).transpose(0, 2, 1)[..., None]  # (B,Cout,N,1)
    return [x_out, edge_map, edge_attr]


# ---------------------------------------------------------------------------
# Deterministic parameter init + example run
# ---------------------------------------------------------------------------
def init_params(key, c_in, c_out):
    ks = jax.random.split(key, 7)

    def uinit(k, shape, fan_in):
        bound = 1.0 / (fan_in ** 0.5)
        return jax.random.uniform(k, shape, jnp.float32, -bound, bound)

    # All weights stored transposed as (in, out) so kernel matmuls are plain
    # last-dim contractions (x @ W^T).
    return {
        "w_lin": uinit(ks[0], (c_in, c_in), c_in),      # 1x1 conv, bias=False
        "w_r":   uinit(ks[1], (c_in, c_out), c_in),
        "b_r":   uinit(ks[2], (1, c_out), c_in),
        "w_l1":  uinit(ks[3], (c_in, c_out), c_in),
        "b_l1":  uinit(ks[4], (1, c_out), c_in),
        "w_l2":  uinit(ks[5], (c_out, c_out), c_out),
        "b_l2":  uinit(ks[6], (1, c_out), c_out),
    }


if __name__ == "__main__":
    B, C, N = 2, 32, 16        # inchannel=32 (divisible by group=32), outchannel=32
    Cout = 32

    key = jax.random.PRNGKey(0)
    k_x, k_map, k_attr, k_p = jax.random.split(key, 4)

    x = jax.random.normal(k_x, (B, C, N, 1), dtype=jnp.float32)

    # adjacency map (0/1) with self-loops so every row has at least one edge
    edge_map = (jax.random.uniform(k_map, (B, N, N)) > 0.5).astype(jnp.float32)
    eye = jnp.eye(N, dtype=jnp.float32)[None]
    edge_map = jnp.maximum(edge_map, eye)

    edge_attr = jax.random.uniform(k_attr, (B, N, N), jnp.float32, 0.1, 1.0)

    params = init_params(k_p, C, Cout)

    out = group_attention_forward(x, edge_map, edge_attr, params)
    x_out = jax.block_until_ready(out[0])

    assert x_out.shape == (B, Cout, N, 1)
    assert bool(jnp.all(jnp.isfinite(x_out)))
    print("KERNEL_OK")
</pallas_src>

<mosaic_0001>
module attributes {stable_mosaic.version = 11 : i64} {
  func.func @_group_attention_kernel(%arg0: i32, %arg1: memref<32x32xf32, #tpu.memory_space<vmem>>, %arg2: memref<2x16x16xf32, #tpu.memory_space<vmem>>, %arg3: memref<2x16x16xf32, #tpu.memory_space<vmem>>, %arg4: memref<32x32xf32, #tpu.memory_space<vmem>>, %arg5: memref<32x32xf32, #tpu.memory_space<vmem>>, %arg6: memref<1x32xf32, #tpu.memory_space<vmem>>, %arg7: memref<32x32xf32, #tpu.memory_space<vmem>>, %arg8: memref<1x32xf32, #tpu.memory_space<vmem>>, %arg9: memref<32x32xf32, #tpu.memory_space<vmem>>, %arg10: memref<1x32xf32, #tpu.memory_space<vmem>>, %arg11: memref<32x32xf32, #tpu.memory_space<vmem>>) attributes {dimension_semantics = [#tpu.dimension_semantics<arbitrary>], iteration_bounds = array<i64: 1>, scalar_prefetch = 0 : i64, scratch_operands = 0 : i64, tpu.core_type = #tpu.core_type<tc>, window_params = [{pipeline_mode = #tpu.pipeline_mode<synchronous>, transform_indices = @transform_0, window_bounds = array<i64: 32, 32>}, {pipeline_mode = #tpu.pipeline_mode<synchronous>, transform_indices = @transform_1, window_bounds = array<i64: 2, 16, 16>}, {pipeline_mode = #tpu.pipeline_mode<synchronous>, transform_indices = @transform_2, window_bounds = array<i64: 2, 16, 16>}, {pipeline_mode = #tpu.pipeline_mode<synchronous>, transform_indices = @transform_3, window_bounds = array<i64: 32, 32>}, {pipeline_mode = #tpu.pipeline_mode<synchronous>, transform_indices = @transform_4, window_bounds = array<i64: 32, 32>}, {pipeline_mode = #tpu.pipeline_mode<synchronous>, transform_indices = @transform_5, window_bounds = array<i64: 1, 32>}, {pipeline_mode = #tpu.pipeline_mode<synchronous>, transform_indices = @transform_6, window_bounds = array<i64: 32, 32>}, {pipeline_mode = #tpu.pipeline_mode<synchronous>, transform_indices = @transform_7, window_bounds = array<i64: 1, 32>}, {pipeline_mode = #tpu.pipeline_mode<synchronous>, transform_indices = @transform_8, window_bounds = array<i64: 32, 32>}, {pipeline_mode = #tpu.pipeline_mode<synchronous>, transform_indices = @transform_9, window_bounds = array<i64: 1, 32>}, {pipeline_mode = #tpu.pipeline_mode<synchronous>, transform_indices = @transform_10, window_bounds = array<i64: 32, 32>}]} {
    %c0 = arith.constant 0 : index
    %c0_0 = arith.constant 0 : index
    %0 = vector.load %arg1[%c0, %c0_0] : memref<32x32xf32, #tpu.memory_space<vmem>>, vector<32x32xf32>
    %c0_1 = arith.constant 0 : index
    %c0_2 = arith.constant 0 : index
    %1 = vector.load %arg4[%c0_1, %c0_2] : memref<32x32xf32, #tpu.memory_space<vmem>>, vector<32x32xf32>
    %2 = arith.truncf %0 : vector<32x32xf32> to vector<32x32xbf16>
    %3 = arith.truncf %1 : vector<32x32xf32> to vector<32x32xbf16>
    %cst = arith.constant dense<0.000000e+00> : vector<32x32xf32>
    %4 = tpu.matmul %2, %3, %cst {dimension_numbers = #tpu.dot_dimension_numbers<[1], [0], [0], [1], [0, 0, 1, 1], [], []>} : vector<32x32xbf16>, vector<32x32xbf16>, vector<32x32xf32> -> vector<32x32xf32>
    %5 = vector.shape_cast %4 : vector<32x32xf32> to vector<2x16x32xf32>
    %cst_3 = arith.constant 0.000000e+00 : f32
    %6 = vector.broadcast %cst_3 : f32 to vector<32x32xf32>
    %7 = arith.cmpf ogt, %4, %6 : vector<32x32xf32>
    %cst_4 = arith.constant 0.000000e+00 : f32
    %8 = vector.broadcast %cst_4 : f32 to vector<32x32xf32>
    %9 = arith.minimumf %4, %8 : vector<32x32xf32>
    %10 = math.exp %9 : vector<32x32xf32>
    %cst_5 = arith.constant 1.000000e+00 : f32
    %11 = vector.broadcast %cst_5 : f32 to vector<32x32xf32>
    %12 = arith.subf %10, %11 : vector<32x32xf32>
    %13 = arith.select %7, %4, %12 : vector<32x32xi1>, vector<32x32xf32>
    %14 = vector.shape_cast %13 : vector<32x32xf32> to vector<2x16x32xf32>
    %15 = arith.truncf %5 : vector<2x16x32xf32> to vector<2x16x32xbf16>
    "tpu.trace_start"() <{level = 10 : i32, message = "bnc,bmc->bnm"}> : () -> ()
    %cst_6 = arith.constant dense<0.000000e+00> : vector<2x16x16xf32>
    %16 = tpu.matmul %15, %15, %cst_6 {dimension_numbers = #tpu.dot_dimension_numbers<[2], [2], [1], [1], [0, 0, 0, 1, 1, 1], [0], [0]>} : vector<2x16x32xbf16>, vector<2x16x32xbf16>, vector<2x16x16xf32> -> vector<2x16x16xf32>
    "tpu.trace_stop"() : () -> ()
    %cst_7 = arith.constant 0.176776692 : f32
    %17 = vector.broadcast %cst_7 : f32 to vector<2x16x16xf32>
    %18 = arith.mulf %16, %17 : vector<2x16x16xf32>
    %c0_8 = arith.constant 0 : index
    %c0_9 = arith.constant 0 : index
    %c0_10 = arith.constant 0 : index
    %19 = vector.load %arg3[%c0_8, %c0_9, %c0_10] : memref<2x16x16xf32, #tpu.memory_space<vmem>>, vector<2x16x16xf32>
    %20 = arith.mulf %19, %18 : vector<2x16x16xf32>
    %c0_11 = arith.constant 0 : index
    %c0_12 = arith.constant 0 : index
    %c0_13 = arith.constant 0 : index
    %21 = vector.load %arg2[%c0_11, %c0_12, %c0_13] : memref<2x16x16xf32, #tpu.memory_space<vmem>>, vector<2x16x16xf32>
    %cst_14 = arith.constant 0.000000e+00 : f32
    %22 = vector.broadcast %cst_14 : f32 to vector<2x16x16xf32>
    %23 = arith.cmpf one, %21, %22 : vector<2x16x16xf32>
    %cst_15 = arith.constant -1.000000e+30 : f32
    %24 = vector.broadcast %cst_15 : f32 to vector<2x16x16xf32>
    %25 = arith.select %23, %20, %24 : vector<2x16x16xi1>, vector<2x16x16xf32>
    %cst_16 = arith.constant dense<0xFF800000> : vector<2x16xf32>
    %26 = vector.multi_reduction <maximumf>, %25, %cst_16 [2] : vector<2x16x16xf32> to vector<2x16xf32>
    %27 = vector.shape_cast %26 : vector<2x16xf32> to vector<2x16x1xf32>
    %28 = vector.broadcast %27 : vector<2x16x1xf32> to vector<2x16x16xf32>
    %29 = arith.subf %25, %28 : vector<2x16x16xf32>
    %30 = math.exp %29 : vector<2x16x16xf32>
    %cst_17 = arith.constant 0.000000e+00 : f32
    %31 = vector.broadcast %cst_17 : f32 to vector<2x16x16xf32>
    %32 = arith.select %23, %30, %31 : vector<2x16x16xi1>, vector<2x16x16xf32>
    %cst_18 = arith.constant dense<0.000000e+00> : vector<2x16xf32>
    %33 = vector.multi_reduction <add>, %32, %cst_18 [2] : vector<2x16x16xf32> to vector<2x16xf32>
    %34 = vector.shape_cast %33 : vector<2x16xf32> to vector<2x16x1xf32>
    %cst_19 = arith.constant 0.000000e+00 : f32
    %35 = vector.broadcast %cst_19 : f32 to vector<2x16x1xf32>
    %36 = arith.cmpf ogt, %34, %35 : vector<2x16x1xf32>
    %cst_20 = arith.constant 1.000000e+00 : f32
    %37 = vector.broadcast %cst_20 : f32 to vector<2x16x1xf32>
    %38 = arith.select %36, %34, %37 : vector<2x16x1xi1>, vector<2x16x1xf32>
    %39 = tpu.reciprocal %38 {approx = true} : vector<2x16x1xf32> -> vector<2x16x1xf32>
    %40 = vector.broadcast %39 : vector<2x16x1xf32> to vector<2x16x16xf32>
    %41 = arith.mulf %32, %40 : vector<2x16x16xf32>
    %42 = arith.truncf %41 : vector<2x16x16xf32> to vector<2x16x16xbf16>
    %43 = arith.truncf %14 : vector<2x16x32xf32> to vector<2x16x32xbf16>
    "tpu.trace_start"() <{level = 10 : i32, message = "bnm,bmc->bnc"}> : () -> ()
    %cst_21 = arith.constant dense<0.000000e+00> : vector<2x16x32xf32>
    %44 = tpu.matmul %42, %43, %cst_21 {dimension_numbers = #tpu.dot_dimension_numbers<[2], [1], [1], [2], [0, 0, 0, 1, 1, 2], [0], [0]>} : vector<2x16x16xbf16>, vector<2x16x32xbf16>, vector<2x16x32xf32> -> vector<2x16x32xf32>
    "tpu.trace_stop"() : () -> ()
    %cst_22 = arith.constant dense<0.000000e+00> : vector<2x16xf32>
    %45 = vector.multi_reduction <add>, %44, %cst_22 [2] : vector<2x16x32xf32> to vector<2x16xf32>
    %46 = vector.shape_cast %45 : vector<2x16xf32> to vector<2x16x1xf32>
    %cst_23 = arith.constant 3.200000e+01 : f32
    %47 = vector.broadcast %cst_23 : f32 to vector<2x16x1xf32>
    %48 = arith.divf %46, %47 : vector<2x16x1xf32>
    %cst_24 = arith.constant dense<0.000000e+00> : vector<2x1xf32>
    %49 = vector.multi_reduction <add>, %48, %cst_24 [1] : vector<2x16x1xf32> to vector<2x1xf32>
    %50 = vector.shape_cast %49 : vector<2x1xf32> to vector<2x1x1xf32>
    %cst_25 = arith.constant 1.600000e+01 : f32
    %51 = vector.broadcast %cst_25 : f32 to vector<2x1x1xf32>
    %52 = arith.divf %50, %51 : vector<2x1x1xf32>
    %53 = vector.broadcast %52 : vector<2x1x1xf32> to vector<2x16x32xf32>
    %54 = arith.subf %44, %53 : vector<2x16x32xf32>
    %55 = arith.mulf %54, %54 : vector<2x16x32xf32>
    %cst_26 = arith.constant dense<0.000000e+00> : vector<2x16xf32>
    %56 = vector.multi_reduction <add>, %55, %cst_26 [2] : vector<2x16x32xf32> to vector<2x16xf32>
    %57 = vector.shape_cast %56 : vector<2x16xf32> to vector<2x16x1xf32>
    %cst_27 = arith.constant 3.200000e+01 : f32
    %58 = vector.broadcast %cst_27 : f32 to vector<2x16x1xf32>
    %59 = arith.divf %57, %58 : vector<2x16x1xf32>
    %cst_28 = arith.constant dense<0.000000e+00> : vector<2x1xf32>
    %60 = vector.multi_reduction <add>, %59, %cst_28 [1] : vector<2x16x1xf32> to vector<2x1xf32>
    %61 = vector.shape_cast %60 : vector<2x1xf32> to vector<2x1x1xf32>
    %cst_29 = arith.constant 1.600000e+01 : f32
    %62 = vector.broadcast %cst_29 : f32 to vector<2x1x1xf32>
    %63 = arith.divf %61, %62 : vector<2x1x1xf32>
    %cst_30 = arith.constant 9.99999974E-6 : f32
    %64 = vector.broadcast %cst_30 : f32 to vector<2x1x1xf32>
    %65 = arith.addf %63, %64 : vector<2x1x1xf32>
    %66 = math.rsqrt %65 : vector<2x1x1xf32>
    %67 = vector.broadcast %66 : vector<2x1x1xf32> to vector<2x16x32xf32>
    %68 = arith.mulf %54, %67 : vector<2x16x32xf32>
    %69 = vector.shape_cast %68 : vector<2x16x32xf32> to vector<32x32xf32>
    %70 = arith.addf %69, %0 : vector<32x32xf32>
    %c0_31 = arith.constant 0 : index
    %c0_32 = arith.constant 0 : index
    %71 = vector.load %arg5[%c0_31, %c0_32] : memref<32x32xf32, #tpu.memory_space<vmem>>, vector<32x32xf32>
    %72 = arith.truncf %70 : vector<32x32xf32> to vector<32x32xbf16>
    %73 = arith.truncf %71 : vector<32x32xf32> to vector<32x32xbf16>
    %cst_33 = arith.constant dense<0.000000e+00> : vector<32x32xf32>
    %74 = tpu.matmul %72, %73, %cst_33 {dimension_numbers = #tpu.dot_dimension_numbers<[1], [0], [0], [1], [0, 0, 1, 1], [], []>} : vector<32x32xbf16>, vector<32x32xbf16>, vector<32x32xf32> -> vector<32x32xf32>
    %c0_34 = arith.constant 0 : index
    %c0_35 = arith.constant 0 : index
    %75 = vector.load %arg6[%c0_34, %c0_35] : memref<1x32xf32, #tpu.memory_space<vmem>>, vector<1x32xf32>
    %76 = vector.broadcast %75 : vector<1x32xf32> to vector<32x32xf32>
    %77 = arith.addf %74, %76 : vector<32x32xf32>
    %cst_36 = arith.constant dense<0.000000e+00> : vector<32xf32>
    %78 = vector.multi_reduction <add>, %77, %cst_36 [0] : vector<32x32xf32> to vector<32xf32>
    %79 = vector.shape_cast %78 : vector<32xf32> to vector<1x32xf32>
    %cst_37 = arith.constant 3.200000e+01 : f32
    %80 = vector.broadcast %cst_37 : f32 to vector<1x32xf32>
    %81 = arith.divf %79, %80 : vector<1x32xf32>
    %82 = vector.broadcast %81 : vector<1x32xf32> to vector<32x32xf32>
    %83 = arith.subf %77, %82 : vector<32x32xf32>
    %84 = arith.mulf %83, %83 : vector<32x32xf32>
    %cst_38 = arith.constant dense<0.000000e+00> : vector<32xf32>
    %85 = vector.multi_reduction <add>, %84, %cst_38 [0] : vector<32x32xf32> to vector<32xf32>
    %86 = vector.shape_cast %85 : vector<32xf32> to vector<1x32xf32>
    %cst_39 = arith.constant 3.200000e+01 : f32
    %87 = vector.broadcast %cst_39 : f32 to vector<1x32xf32>
    %88 = arith.divf %86, %87 : vector<1x32xf32>
    %cst_40 = arith.constant 9.99999974E-6 : f32
    %89 = vector.broadcast %cst_40 : f32 to vector<1x32xf32>
    %90 = arith.addf %88, %89 : vector<1x32xf32>
    %91 = math.rsqrt %90 : vector<1x32xf32>
    %92 = vector.broadcast %91 : vector<1x32xf32> to vector<32x32xf32>
    %93 = arith.mulf %83, %92 : vector<32x32xf32>
    %c0_41 = arith.constant 0 : index
    %c0_42 = arith.constant 0 : index
    %94 = vector.load %arg7[%c0_41, %c0_42] : memref<32x32xf32, #tpu.memory_space<vmem>>, vector<32x32xf32>
    %95 = arith.truncf %70 : vector<32x32xf32> to vector<32x32xbf16>
    %96 = arith.truncf %94 : vector<32x32xf32> to vector<32x32xbf16>
    %cst_43 = arith.constant dense<0.000000e+00> : vector<32x32xf32>
    %97 = tpu.matmul %95, %96, %cst_43 {dimension_numbers = #tpu.dot_dimension_numbers<[1], [0], [0], [1], [0, 0, 1, 1], [], []>} : vector<32x32xbf16>, vector<32x32xbf16>, vector<32x32xf32> -> vector<32x32xf32>
    %c0_44 = arith.constant 0 : index
    %c0_45 = arith.constant 0 : index
    %98 = vector.load %arg8[%c0_44, %c0_45] : memref<1x32xf32, #tpu.memory_space<vmem>>, vector<1x32xf32>
    %99 = vector.broadcast %98 : vector<1x32xf32> to vector<32x32xf32>
    %100 = arith.addf %97, %99 : vector<32x32xf32>
    %101 = vector.shape_cast %100 : vector<32x32xf32> to vector<2x16x32xf32>
    %cst_46 = arith.constant dense<0.000000e+00> : vector<2x32xf32>
    %102 = vector.multi_reduction <add>, %101, %cst_46 [1] : vector<2x16x32xf32> to vector<2x32xf32>
    %103 = vector.shape_cast %102 : vector<2x32xf32> to vector<2x1x32xf32>
    %cst_47 = arith.constant 1.600000e+01 : f32
    %104 = vector.broadcast %cst_47 : f32 to vector<2x1x32xf32>
    %105 = arith.divf %103, %104 : vector<2x1x32xf32>
    %106 = vector.broadcast %105 : vector<2x1x32xf32> to vector<2x16x32xf32>
    %107 = arith.subf %101, %106 : vector<2x16x32xf32>
    %108 = arith.mulf %107, %107 : vector<2x16x32xf32>
    %cst_48 = arith.constant dense<0.000000e+00> : vector<2x32xf32>
    %109 = vector.multi_reduction <add>, %108, %cst_48 [1] : vector<2x16x32xf32> to vector<2x32xf32>
    %110 = vector.shape_cast %109 : vector<2x32xf32> to vector<2x1x32xf32>
    %cst_49 = arith.constant 1.600000e+01 : f32
    %111 = vector.broadcast %cst_49 : f32 to vector<2x1x32xf32>
    %112 = arith.divf %110, %111 : vector<2x1x32xf32>
    %cst_50 = arith.constant 9.99999974E-6 : f32
    %113 = vector.broadcast %cst_50 : f32 to vector<2x1x32xf32>
    %114 = arith.addf %112, %113 : vector<2x1x32xf32>
    %115 = math.rsqrt %114 : vector<2x1x32xf32>
    %116 = vector.broadcast %115 : vector<2x1x32xf32> to vector<2x16x32xf32>
    %117 = arith.mulf %107, %116 : vector<2x16x32xf32>
    %118 = vector.shape_cast %117 : vector<2x16x32xf32> to vector<32x32xf32>
    %cst_51 = arith.constant dense<0.000000e+00> : vector<32xf32>
    %119 = vector.multi_reduction <add>, %118, %cst_51 [0] : vector<32x32xf32> to vector<32xf32>
    %120 = vector.shape_cast %119 : vector<32xf32> to vector<1x32xf32>
    %cst_52 = arith.constant 3.200000e+01 : f32
    %121 = vector.broadcast %cst_52 : f32 to vector<1x32xf32>
    %122 = arith.divf %120, %121 : vector<1x32xf32>
    %123 = vector.broadcast %122 : vector<1x32xf32> to vector<32x32xf32>
    %124 = arith.subf %118, %123 : vector<32x32xf32>
    %125 = arith.mulf %124, %124 : vector<32x32xf32>
    %cst_53 = arith.constant dense<0.000000e+00> : vector<32xf32>
    %126 = vector.multi_reduction <add>, %125, %cst_53 [0] : vector<32x32xf32> to vector<32xf32>
    %127 = vector.shape_cast %126 : vector<32xf32> to vector<1x32xf32>
    %cst_54 = arith.constant 3.200000e+01 : f32
    %128 = vector.broadcast %cst_54 : f32 to vector<1x32xf32>
    %129 = arith.divf %127, %128 : vector<1x32xf32>
    %cst_55 = arith.constant 9.99999974E-6 : f32
    %130 = vector.broadcast %cst_55 : f32 to vector<1x32xf32>
    %131 = arith.addf %129, %130 : vector<1x32xf32>
    %132 = math.rsqrt %131 : vector<1x32xf32>
    %133 = vector.broadcast %132 : vector<1x32xf32> to vector<32x32xf32>
    %134 = arith.mulf %124, %133 : vector<32x32xf32>
    %cst_56 = arith.constant 0.000000e+00 : f32
    %135 = vector.broadcast %cst_56 : f32 to vector<32x32xf32>
    %136 = arith.maximumf %134, %135 : vector<32x32xf32>
    %c0_57 = arith.constant 0 : index
    %c0_58 = arith.constant 0 : index
    %137 = vector.load %arg9[%c0_57, %c0_58] : memref<32x32xf32, #tpu.memory_space<vmem>>, vector<32x32xf32>
    %138 = arith.truncf %136 : vector<32x32xf32> to vector<32x32xbf16>
    %139 = arith.truncf %137 : vector<32x32xf32> to vector<32x32xbf16>
    %cst_59 = arith.constant dense<0.000000e+00> : vector<32x32xf32>
    %140 = tpu.matmul %138, %139, %cst_59 {dimension_numbers = #tpu.dot_dimension_numbers<[1], [0], [0], [1], [0, 0, 1, 1], [], []>} : vector<32x32xbf16>, vector<32x32xbf16>, vector<32x32xf32> -> vector<32x32xf32>
    %c0_60 = arith.constant 0 : index
    %c0_61 = arith.constant 0 : index
    %141 = vector.load %arg10[%c0_60, %c0_61] : memref<1x32xf32, #tpu.memory_space<vmem>>, vector<1x32xf32>
    %142 = vector.broadcast %141 : vector<1x32xf32> to vector<32x32xf32>
    %143 = arith.addf %140, %142 : vector<32x32xf32>
    %144 = vector.shape_cast %143 : vector<32x32xf32> to vector<2x16x32xf32>
    %cst_62 = arith.constant dense<0.000000e+00> : vector<2x32xf32>
    %145 = vector.multi_reduction <add>, %144, %cst_62 [1] : vector<2x16x32xf32> to vector<2x32xf32>
    %146 = vector.shape_cast %145 : vector<2x32xf32> to vector<2x1x32xf32>
    %cst_63 = arith.constant 1.600000e+01 : f32
    %147 = vector.broadcast %cst_63 : f32 to vector<2x1x32xf32>
    %148 = arith.divf %146, %147 : vector<2x1x32xf32>
    %149 = vector.broadcast %148 : vector<2x1x32xf32> to vector<2x16x32xf32>
    %150 = arith.subf %144, %149 : vector<2x16x32xf32>
    %151 = arith.mulf %150, %150 : vector<2x16x32xf32>
    %cst_64 = arith.constant dense<0.000000e+00> : vector<2x32xf32>
    %152 = vector.multi_reduction <add>, %151, %cst_64 [1] : vector<2x16x32xf32> to vector<2x32xf32>
    %153 = vector.shape_cast %152 : vector<2x32xf32> to vector<2x1x32xf32>
    %cst_65 = arith.constant 1.600000e+01 : f32
    %154 = vector.broadcast %cst_65 : f32 to vector<2x1x32xf32>
    %155 = arith.divf %153, %154 : vector<2x1x32xf32>
    %cst_66 = arith.constant 9.99999974E-6 : f32
    %156 = vector.broadcast %cst_66 : f32 to vector<2x1x32xf32>
    %157 = arith.addf %155, %156 : vector<2x1x32xf32>
    %158 = math.rsqrt %157 : vector<2x1x32xf32>
    %159 = vector.broadcast %158 : vector<2x1x32xf32> to vector<2x16x32xf32>
    %160 = arith.mulf %150, %159 : vector<2x16x32xf32>
    %161 = vector.shape_cast %160 : vector<2x16x32xf32> to vector<32x32xf32>
    %cst_67 = arith.constant dense<0.000000e+00> : vector<32xf32>
    %162 = vector.multi_reduction <add>, %161, %cst_67 [0] : vector<32x32xf32> to vector<32xf32>
    %163 = vector.shape_cast %162 : vector<32xf32> to vector<1x32xf32>
    %cst_68 = arith.constant 3.200000e+01 : f32
    %164 = vector.broadcast %cst_68 : f32 to vector<1x32xf32>
    %165 = arith.divf %163, %164 : vector<1x32xf32>
    %166 = vector.broadcast %165 : vector<1x32xf32> to vector<32x32xf32>
    %167 = arith.subf %161, %166 : vector<32x32xf32>
    %168 = arith.mulf %167, %167 : vector<32x32xf32>
    %cst_69 = arith.constant dense<0.000000e+00> : vector<32xf32>
    %169 = vector.multi_reduction <add>, %168, %cst_69 [0] : vector<32x32xf32> to vector<32xf32>
    %170 = vector.shape_cast %169 : vector<32xf32> to vector<1x32xf32>
    %cst_70 = arith.constant 3.200000e+01 : f32
    %171 = vector.broadcast %cst_70 : f32 to vector<1x32xf32>
    %172 = arith.divf %170, %171 : vector<1x32xf32>
    %cst_71 = arith.constant 9.99999974E-6 : f32
    %173 = vector.broadcast %cst_71 : f32 to vector<1x32xf32>
    %174 = arith.addf %172, %173 : vector<1x32xf32>
    %175 = math.rsqrt %174 : vector<1x32xf32>
    %176 = vector.broadcast %175 : vector<1x32xf32> to vector<32x32xf32>
    %177 = arith.mulf %167, %176 : vector<32x32xf32>
    %178 = arith.addf %177, %93 : vector<32x32xf32>
    %cst_72 = arith.constant 0.000000e+00 : f32
    %179 = vector.broadcast %cst_72 : f32 to vector<32x32xf32>
    %180 = arith.maximumf %178, %179 : vector<32x32xf32>
    %c0_73 = arith.constant 0 : index
    %c0_74 = arith.constant 0 : index
    %181 = vector.load %arg11[%c0_73, %c0_74] : memref<32x32xf32, #tpu.memory_space<vmem>>, vector<32x32xf32>
    tpu.vector_store %arg11[%c0_73, %c0_74], %180 {strides = array<i32>} : memref<32x32xf32, #tpu.memory_space<vmem>>, vector<32x32xf32>,
    return
  }
  func.func @transform_0(%arg0: i32) -> (i32, i32) {
    %c0_i32 = arith.constant 0 : i32
    %c0_i32_0 = arith.constant 0 : i32
    %c0_i32_1 = arith.constant 0 : i32
    return %c0_i32, %c0_i32_0 : i32, i32
  }
  func.func @transform_1(%arg0: i32) -> (i32, i32, i32) {
    %c0_i32 = arith.constant 0 : i32
    %c0_i32_0 = arith.constant 0 : i32
    %c0_i32_1 = arith.constant 0 : i32
    %c0_i32_2 = arith.constant 0 : i32
    return %c0_i32, %c0_i32_0, %c0_i32_1 : i32, i32, i32
  }
  func.func @transform_2(%arg0: i32) -> (i32, i32, i32) {
    %c0_i32 = arith.constant 0 : i32
    %c0_i32_0 = arith.constant 0 : i32
    %c0_i32_1 = arith.constant 0 : i32
    %c0_i32_2 = arith.constant 0 : i32
    return %c0_i32, %c0_i32_0, %c0_i32_1 : i32, i32, i32
  }
  func.func @transform_3(%arg0: i32) -> (i32, i32) {
    %c0_i32 = arith.constant 0 : i32
    %c0_i32_0 = arith.constant 0 : i32
    %c0_i32_1 = arith.constant 0 : i32
    return %c0_i32, %c0_i32_0 : i32, i32
  }
  func.func @transform_4(%arg0: i32) -> (i32, i32) {
    %c0_i32 = arith.constant 0 : i32
    %c0_i32_0 = arith.constant 0 : i32
    %c0_i32_1 = arith.constant 0 : i32
    return %c0_i32, %c0_i32_0 : i32, i32
  }
  func.func @transform_5(%arg0: i32) -> (i32, i32) {
    %c0_i32 = arith.constant 0 : i32
    %c0_i32_0 = arith.constant 0 : i32
    %c0_i32_1 = arith.constant 0 : i32
    return %c0_i32, %c0_i32_0 : i32, i32
  }
  func.func @transform_6(%arg0: i32) -> (i32, i32) {
    %c0_i32 = arith.constant 0 : i32
    %c0_i32_0 = arith.constant 0 : i32
    %c0_i32_1 = arith.constant 0 : i32
    return %c0_i32, %c0_i32_0 : i32, i32
  }
  func.func @transform_7(%arg0: i32) -> (i32, i32) {
    %c0_i32 = arith.constant 0 : i32
    %c0_i32_0 = arith.constant 0 : i32
    %c0_i32_1 = arith.constant 0 : i32
    return %c0_i32, %c0_i32_0 : i32, i32
  }
  func.func @transform_8(%arg0: i32) -> (i32, i32) {
    %c0_i32 = arith.constant 0 : i32
    %c0_i32_0 = arith.constant 0 : i32
    %c0_i32_1 = arith.constant 0 : i32
    return %c0_i32, %c0_i32_0 : i32, i32
  }
  func.func @transform_9(%arg0: i32) -> (i32, i32) {
    %c0_i32 = arith.constant 0 : i32
    %c0_i32_0 = arith.constant 0 : i32
    %c0_i32_1 = arith.constant 0 : i32
    return %c0_i32, %c0_i32_0 : i32, i32
  }
  func.func @transform_10(%arg0: i32) -> (i32, i32) {
    %c0_i32 = arith.constant 0 : i32
    %c0_i32_0 = arith.constant 0 : i32
    %c0_i32_1 = arith.constant 0 : i32
    return %c0_i32, %c0_i32_0 : i32, i32
  }
}

</mosaic_0001>

<bundles_post_ra>
// kernel: tpu_custom_call.1
= control target key start
LH: loop header
LB: loop body
LE: loop exit
PB: predicated region body
PF: predicated region fallthrough
CT: control target
= control target key end

     0   :  { %15 = vsyncpa [#allocation3], 0  ;;  %s1744_s0 = inlined_call_operand.hbm [shape: f32[32,32], index: 0, kind: input, shape index: {}]   ;;  %s1745_s1 = inlined_call_operand.hbm [shape: f32[2,16,16], index: 1, kind: input, shape index: {}]   ;;  %s1746_s2 = inlined_call_operand.hbm [shape: f32[2,16,16], index: 2, kind: input, shape index: {}]   ;;  %s1747_s3 = inlined_call_operand.hbm [shape: f32[32,32], index: 3, kind: input, shape index: {}]   ;;  %s1748_s4 = inlined_call_operand.hbm [shape: f32[32,32], index: 4, kind: input, shape index: {}]   ;;  %s1749_s5 = inlined_call_operand.vmem [shape: f32[1,32], index: 5, kind: input, shape index: {}]   ;;  %s1750_s6 = inlined_call_operand.hbm [shape: f32[32,32], index: 6, kind: input, shape index: {}]   ;;  %s1751_s7 = inlined_call_operand.vmem [shape: f32[1,32], index: 7, kind: input, shape index: {}]   ;;  %s1752_s8 = inlined_call_operand.hbm [shape: f32[32,32], index: 8, kind: input, shape index: {}]   ;;  %s1753_s9 = inlined_call_operand.vmem [shape: f32[1,32], index: 9, kind: input, shape index: {}]   ;;  %s1754_s10 = inlined_call_operand.hbm [shape: f32[32,32], index: 10, kind: output, shape index: {}]  }
   0x1   :  { %16 = vsyncpa [#allocation6], 0 }
   0x2   :  { %17 = vsyncpa [#allocation9], 0 }
   0x3   :  { %18 = vsyncpa [#allocation12], 0 }
   0x4   :  { %19 = vsyncpa [#allocation4], 0  ;;  %s1388_s13 = smov [#allocation5]   ;;  %s1389_s15 = smov [#allocation8]  }
   0x5   :  { %s37_s14 = sshll.u32 %s1388_s13, 4  ;;  %s61_s16 = sshll.u32 %s1389_s15, 4  ;;  %s38_s14 = int_to_ptr.vmem [resolvable:$true] %s37_s14  ;;  %s1455_s16 = int_to_ptr.vmem [resolvable:$true] %s61_s16 }
   0x6   :  { %s1202_s19 = scalar_lea.hbm %s1745_s1, 512 }
   0x7   :  { %p1203_p0 = scmp.ne.s32.totalorder %s1745_s1, %s1202_s19  ;;  %p1206_p1 = scmp.lt.u32.totalorder %s1202_s19, %s1745_s1 }
   0x9   :  { %p1208_p2 = pnand %p1206_p1, %p1203_p0 }
   0xb   :  { %1211 = shalt.err (!%p1208_p2)
}
   0xc   :  { %s1212_s24 = scalar_lea.vmem %s38_s14, 512  ;;  %p1217_p4 = scmp.lt.s32.totalorder %s38_s14, %s38_s14 }
   0xd   :  { %p1213_p3 = scmp.ne.s32.totalorder %s38_s14, %s1212_s24  ;;  %p1218_p5 = scmp.lt.s32.totalorder %s1212_s24, %s1212_s24 }
   0xf   :  { %p1219_p6 = por %p1218_p5, %p1217_p4 }
  0x11   :  { %p1220_p7 = pnand %p1219_p6, %p1213_p3 }
  0x13   :  { %1223 = shalt.err (!%p1220_p7)
}
  0x14   :  { %s1390_s25 = smov 128   ;;  %s1391_s26 = smov 8  }
  0x15   :  { %43 = dma.hbm_to_vmem [thread:$0]  %s1745_s1, 512, %s38_s14, [#allocation6], %s1390_s25, %s1390_s25, %s1391_s26  }
  0x16   :  { %s1224_s11 = scalar_lea.hbm %s1747_s3, 512 }
  0x17   :  { %p1225_p8 = scmp.ne.s32.totalorder %s1747_s3, %s1224_s11  ;;  %p1228_p9 = scmp.lt.u32.totalorder %s1224_s11, %s1747_s3 }
  0x19   :  { %p1230_p10 = pnand %p1228_p9, %p1225_p8 }
  0x1b   :  { %1233 = shalt.err (!%p1230_p10)
}
  0x1c   :  { %s1234_s18 = scalar_lea.vmem %s1455_s16, 512  ;;  %p1239_p12 = scmp.lt.s32.totalorder %s1455_s16, %s1455_s16 }
  0x1d   :  { %p1235_p11 = scmp.ne.s32.totalorder %s1455_s16, %s1234_s18  ;;  %p1240_p13 = scmp.lt.s32.totalorder %s1234_s18, %s1234_s18 }
  0x1f   :  { %p1241_p0 = por %p1240_p13, %p1239_p12 }
  0x21   :  { %p1242_p1 = pnand %p1241_p0, %p1235_p11 }
  0x23   :  { %1245 = shalt.err (!%p1242_p1)
}
  0x24   :  { %67 = dma.hbm_to_vmem [thread:$0]  %s1747_s3, 512, %s1455_s16, [#allocation9], %s1390_s25, %s1390_s25, %s1391_s26  }
  0x25   :  { %s1392_s19 = smov [#allocation11]   ;;  %s1393_s21 = smov [#allocation2]  }
  0x26   :  { %s87_s20 = sshll.u32 %s1392_s19, 4  ;;  %s25_s22 = sshll.u32 %s1393_s21, 4  ;;  %s88_s20 = int_to_ptr.vmem [resolvable:$true] %s87_s20  ;;  %s1492_s22 = int_to_ptr.vmem [resolvable:$true] %s25_s22 }
  0x27   :  { %s1246_s27 = scalar_lea.hbm %s1750_s6, 512 }
  0x28   :  { %p1247_p2 = scmp.ne.s32.totalorder %s1750_s6, %s1246_s27  ;;  %p1250_p3 = scmp.lt.u32.totalorder %s1246_s27, %s1750_s6 }
  0x2a   :  { %p1252_p4 = pnand %p1250_p3, %p1247_p2 }
  0x2c   :  { %1255 = shalt.err (!%p1252_p4)
}
  0x2d   :  { %s1256_s3 = scalar_lea.vmem %s88_s20, 512  ;;  %p1261_p6 = scmp.lt.s32.totalorder %s88_s20, %s88_s20 }
  0x2e   :  { %p1257_p5 = scmp.ne.s32.totalorder %s88_s20, %s1256_s3  ;;  %p1262_p7 = scmp.lt.s32.totalorder %s1256_s3, %s1256_s3 }
  0x30   :  { %p1263_p8 = por %p1262_p7, %p1261_p6 }
  0x32   :  { %p1264_p9 = pnand %p1263_p8, %p1257_p5 }
  0x34   :  { %1267 = shalt.err (!%p1264_p9)
}
  0x35   :  { %93 = dma.hbm_to_vmem [thread:$0]  %s1750_s6, 512, %s88_s20, [#allocation12], %s1390_s25, %s1390_s25, %s1391_s26  }
  0x36   :  { %s1268_s17 = scalar_lea.hbm %s1744_s0, 512 }
  0x37   :  { %p1269_p10 = scmp.ne.s32.totalorder %s1744_s0, %s1268_s17  ;;  %p1272_p11 = scmp.lt.u32.totalorder %s1268_s17, %s1744_s0 }
  0x39   :  { %p1274_p12 = pnand %p1272_p11, %p1269_p10 }
  0x3b   :  { %1277 = shalt.err (!%p1274_p12)
}
  0x3c   :  { %s1278_s21 = scalar_lea.vmem %s1492_s22, 512  ;;  %p1283_p0 = scmp.lt.s32.totalorder %s1492_s22, %s1492_s22 }
  0x3d   :  { %p1279_p13 = scmp.ne.s32.totalorder %s1492_s22, %s1278_s21  ;;  %p1284_p1 = scmp.lt.s32.totalorder %s1278_s21, %s1278_s21 }
  0x3f   :  { %p1285_p2 = por %p1284_p1, %p1283_p0 }
  0x41   :  { %p1286_p3 = pnand %p1285_p2, %p1279_p13 }
  0x43   :  { %1289 = shalt.err (!%p1286_p3)
}
  0x44   :  { %31 = dma.hbm_to_vmem [thread:$0]  %s1744_s0, 512, %s1492_s22, [#allocation3], %s1390_s25, %s1390_s25, %s1391_s26  }
  0x45   :  { %s1394_s23 = smov [#allocation7]   ;;  %s1395_s27 = smov [#allocation10]  }
  0x46   :  { %s49_s24 = sshll.u32 %s1394_s23, 4  ;;  %s73_s28 = sshll.u32 %s1395_s27, 4  ;;  %s50_s24 = int_to_ptr.vmem [resolvable:$true] %s49_s24  ;;  %s1529_s28 = int_to_ptr.vmem [resolvable:$true] %s73_s28 }
  0x47   :  { %s1290_s11 = scalar_lea.hbm %s1746_s2, 512 }
  0x48   :  { %p1291_p4 = scmp.ne.s32.totalorder %s1746_s2, %s1290_s11  ;;  %p1294_p5 = scmp.lt.u32.totalorder %s1290_s11, %s1746_s2 }
  0x4a   :  { %p1296_p6 = pnand %p1294_p5, %p1291_p4 }
  0x4c   :  { %1299 = shalt.err (!%p1296_p6)
}
  0x4d   :  { %s1300_s0 = scalar_lea.vmem %s50_s24, 512  ;;  %p1305_p8 = scmp.lt.s32.totalorder %s50_s24, %s50_s24 }
  0x4e   :  { %p1301_p7 = scmp.ne.s32.totalorder %s50_s24, %s1300_s0  ;;  %p1306_p9 = scmp.lt.s32.totalorder %s1300_s0, %s1300_s0 }
  0x50   :  { %p1307_p10 = por %p1306_p9, %p1305_p8 }
  0x52   :  { %p1308_p11 = pnand %p1307_p10, %p1301_p7 }
  0x54   :  { %1311 = shalt.err (!%p1308_p11)
}
  0x55   :  { %55 = dma.hbm_to_vmem [thread:$0]  %s1746_s2, 512, %s50_s24, [#allocation6], %s1390_s25, %s1390_s25, %s1391_s26  }
  0x56   :  { %s1312_s1 = scalar_lea.hbm %s1748_s4, 512 }
  0x57   :  { %p1313_p12 = scmp.ne.s32.totalorder %s1748_s4, %s1312_s1  ;;  %p1316_p13 = scmp.lt.u32.totalorder %s1312_s1, %s1748_s4 }
  0x59   :  { %p1318_p0 = pnand %p1316_p13, %p1313_p12 }
  0x5b   :  { %1321 = shalt.err (!%p1318_p0)
}
  0x5c   :  { %s1322_s20 = scalar_lea.vmem %s1529_s28, 512  ;;  %p1327_p2 = scmp.lt.s32.totalorder %s1529_s28, %s1529_s28 }
  0x5d   :  { %p1323_p1 = scmp.ne.s32.totalorder %s1529_s28, %s1322_s20  ;;  %p1328_p3 = scmp.lt.s32.totalorder %s1322_s20, %s1322_s20 }
  0x5f   :  { %p1329_p4 = por %p1328_p3, %p1327_p2 }
  0x61   :  { %p1330_p5 = pnand %p1329_p4, %p1323_p1 }
  0x63   :  { %1333 = shalt.err (!%p1330_p5)
}
  0x64   :  { %79 = dma.hbm_to_vmem [thread:$0]  %s1748_s4, 512, %s1529_s28, [#allocation9], %s1390_s25, %s1390_s25, %s1391_s26  }
  0x65   :  { %s1396_s24 = smov [#allocation13]   ;;  %s1334_s11 = scalar_lea.hbm %s1752_s8, 512 }
  0x66   :  { %s101_s27 = sshll.u32 %s1396_s24, 4  ;;  %p1335_p6 = scmp.ne.s32.totalorder %s1752_s8, %s1334_s11  ;;  %s102_s27 = int_to_ptr.vmem [resolvable:$true] %s101_s27 }
  0x67   :  { %p1338_p7 = scmp.lt.u32.totalorder %s1334_s11, %s1752_s8 }
  0x69   :  { %p1340_p8 = pnand %p1338_p7, %p1335_p6 }
  0x6b   :  { %1343 = shalt.err (!%p1340_p8)
}
  0x6c   :  { %s1344_s0 = scalar_lea.vmem %s102_s27, 512  ;;  %p1349_p10 = scmp.lt.s32.totalorder %s102_s27, %s102_s27 }
  0x6d   :  { %p1345_p9 = scmp.ne.s32.totalorder %s102_s27, %s1344_s0  ;;  %p1350_p11 = scmp.lt.s32.totalorder %s1344_s0, %s1344_s0 }
  0x6f   :  { %p1351_p12 = por %p1350_p11, %p1349_p10 }
  0x71   :  { %p1352_p13 = pnand %p1351_p12, %p1345_p9 }
  0x73   :  { %1355 = shalt.err (!%p1352_p13)
}
  0x74   :  { %107 = dma.hbm_to_vmem [thread:$0]  %s1752_s8, 512, %s102_s27, [#allocation12], %s1390_s25, %s1390_s25, %s1391_s26  }
  0x75   :  { %1378 = dma.done.wait [#allocation3], 512  }
  0x76   :  { %1379 = vsyncadd [#allocation3], 4294966784 }
  0x77   :  { %1380 = dma.done.wait [#allocation6], 1024  }
  0x78   :  { %1381 = vsyncadd [#allocation6], 4294966272 }
  0x79   :  { %1382 = dma.done.wait [#allocation9], 1024  }
  0x7a   :  { %1383 = vsyncadd [#allocation9], 4294966272 }
  0x7b   :  { %1384 = dma.done.wait [#allocation12], 1024  }
  0x7c   :  { %1385 = vsyncadd [#allocation12], 4294966272  ;;  %v136_v0 = vld [vmem:[#allocation8] sm:$0xff]  ;;  %v137_v1 = vld [vmem:[#allocation8 + $0x8] sm:$0xff]  ;;  %vm144_vm0 = vcmask 261120   ;;  %v1397_v12 = vmov 0.0  }
  0x7d   :  { %v138_v2 = vld [vmem:[#allocation8 + $0x10] sm:$0xff]  ;;  %v142_v3 = vpack.c.bf16 %v137_v1, %v136_v0  ;;  %v139_v4 = vld [vmem:[#allocation8 + $0x18] sm:$0xff]  ;;  %v1581_v5 = vld [vmem:[#allocation2] sm:$0xff]  ;;  %1100 = vmatprep.subr.bf16.mxu1 %v1397_v12  ;;  %vm1398_vm1 = vmmov 0   ;;  %vm338_vm7 = vcmask 130048  }
  0x7e   :  { %v1583_v6 = vld [vmem:[#allocation2 + $0x8] sm:$0xff]  ;;  %v143_v7 = vpack.c.bf16 %v139_v4, %v138_v2  ;;  %v1588_v9 = vld [vmem:[#allocation2 + $0x10] sm:$0xff]  ;;  %v1590_v10 = vld [vmem:[#allocation2 + $0x18] sm:$0xff]  ;;  %1102 = vmatprep.mubr.msk.bf16.mxu1 %vm1398_vm1, %v1397_v12 }
  0x7f   :  { %v140_v8 = vpack.c.bf16 %v1583_v6, %v1581_v5  ;;  %1092 = vmatprep.subr.bf16.mxu0 %v142_v3  ;;  %v141_v11 = vpack.c.bf16 %v1590_v10, %v1588_v9  ;;  %v1603_v43 = vld [vmem:[#allocation5 + $0x10] sm:$0xff]  ;;  %v318_v46 = vld [vmem:[#allocation7] sm:$0xff]  ;;  %v321_v47 = vld [vmem:[#allocation7 + $0x18] sm:$0xff] }
  0x80   :  { %1093 = vmatpush3.bf16.msra.mxu0 %v142_v3  ;;  %v320_v44 = vld [vmem:[#allocation7 + $0x10] sm:$0xff]  ;;  %v326_v48 = vld [vmem:[#allocation5] sm:$0xff]  ;;  %vm332_vm6 = vcmp.ne.f32.partialorder %v1603_v43, 0.0  ;;  %v329_v52 = vld [vmem:[#allocation5 + $0x18] sm:$0xff] }
  0x81   :  { %1096 = vmatprep.mubr.msk.bf16.mxu0 %vm144_vm0, %v140_v8  ;;  %1094 = vmatprep.subr.bf16.mxu0 %v143_v7  ;;  %v319_v56 = vld [vmem:[#allocation7 + $0x8] sm:$0xff]  ;;  %vm330_vm8 = vcmp.ne.f32.partialorder %v326_v48, 0.0  ;;  %vm333_vm9 = vcmp.ne.f32.partialorder %v329_v52, 0.0 }
  0x82   :  { %v327_v57 = vld [vmem:[#allocation5 + $0x8] sm:$0xff] }
  0x83   :  { %vm331_vm10 = vcmp.ne.f32.partialorder %v327_v57, 0.0 }
  0x84   :  { %1095 = vmatpush3.bf16.msra.mxu0 %v143_v7 }
  0x85   :  { %1106 = vmatprep.subr.bf16.mxu0 %v1397_v12 }
  0x87   :  { %1097 = vmatmul.mubr.msk.bf16.vlgmr.msra.gmra.mrb[0].mxu0 %vm144_vm0, %v141_v11 }
  0x88   :  { %1108 = vmatprep.mubr.msk.bf16.mxu0 %vm1398_vm1, %v1397_v12 }
 0x15a   :  { %v1098_v13 = vpop.f32.mrb[0].mxu0 }
 0x15b   :  { %v206_v14 = vmin.f32 %v1098_v13, 0.0  ;;  %v185_v15 = vpop.f32.mrb[1].mxu0  ;;  %vm202_vm2 = vcmp.gt.f32.partialorder %v1098_v13, 0.0 }
 0x15c   :  { %v204_v16 = vmin.f32 %v185_v15, 0.0  ;;  %v1099_v17 = vpop.f32.mrb[2].mxu0  ;;  %vm200_vm4 = vcmp.gt.f32.partialorder %v185_v15, 0.0 }
 0x15d   :  { %v212_v18 = vmul.f32 1.442695, %v206_v14  ;;  %v207_v19 = vmin.f32 %v1099_v17, 0.0  ;;  %v188_v20 = vpop.f32.mrb[3].mxu0  ;;  %v225_v21 = vpack.c.bf16 %v1099_v17, %v1098_v13  ;;  %vm203_vm3 = vcmp.gt.f32.partialorder %v1099_v17, 0.0 }
 0x15e   :  { %v208_v22 = vmul.f32 1.442695, %v204_v16  ;;  %v205_v23 = vmin.f32 %v188_v20, 0.0  ;;  %v224_v24 = vpack.c.bf16 %v188_v20, %v185_v15  ;;  %vm201_vm5 = vcmp.gt.f32.partialorder %v188_v20, 0.0 }
 0x15f   :  { %1160 = vpow2.f32 %v212_v18  ;;  %v214_v25 = vmul.f32 1.442695, %v207_v19  ;;  %v271_v26 = vsel %vm144_vm0, %v225_v21, 0 }
 0x160   :  { %1162 = vpow2.f32 %v208_v22  ;;  %v210_v27 = vmul.f32 1.442695, %v205_v23  ;;  %1107 = vmatpush3.bf16.xpose.msra.mxu0 %v271_v26  ;;  %v227_v28 = vsel %vm144_vm0, %v224_v24, 0 }
 0x161   :  { %1164 = vpow2.f32 %v214_v25  ;;  %1101 = vmatpush3.bf16.xpose.msra.mxu1 %v227_v28  ;;  %1118 = vmatprep.subr.bf16.mxu0 %v1397_v12 }
 0x162   :  { %1166 = vpow2.f32 %v210_v27  ;;  %1112 = vmatprep.subr.bf16.mxu1 %v1397_v12 }
 0x167   :  { %1109 = vmatmul.mubr.msk.bf16.vlgmr.msra.gmra.mrb[4].mxu0 %vm144_vm0, %v225_v21 }
 0x168   :  { %1103 = vmatmul.mubr.msk.bf16.vlgmr.msra.gmra.mrb[0].mxu1 %vm144_vm0, %v224_v24  ;;  %1120 = vmatprep.mubr.msk.bf16.mxu0 %vm1398_vm1, %v1397_v12 }
 0x169   :  { %v1161_v29 = vpop.eup %1160  ;;  %1114 = vmatprep.mubr.msk.bf16.mxu1 %vm1398_vm1, %v1397_v12 }
 0x16a   :  { %v1163_v30 = vpop.eup %1162  ;;  %v1053_v31 = vadd.f32 -1.0, %v1161_v29 }
 0x16b   :  { %v1165_v32 = vpop.eup %1164  ;;  %v1051_v33 = vadd.f32 -1.0, %v1163_v30 }
 0x16c   :  { %v1167_v34 = vpop.eup %1166  ;;  %v1054_v35 = vadd.f32 -1.0, %v1165_v32  ;;  %v222_v37 = vsel %vm202_vm2, %v1098_v13, %v1053_v31 }
 0x16d   :  { %v1052_v36 = vadd.f32 -1.0, %v1167_v34  ;;  %v220_v39 = vsel %vm200_vm4, %v185_v15, %v1051_v33 }
 0x16e   :  { %v223_v38 = vsel %vm203_vm3, %v1099_v17, %v1054_v35 }
 0x16f   :  { %v398_v40 = vpack.c.bf16 %v223_v38, %v222_v37  ;;  %v221_v41 = vsel %vm201_vm5, %v188_v20, %v1052_v36 }
 0x170   :  { %v397_v42 = vpack.c.bf16 %v221_v41, %v220_v39 }
 0x171   :  { %1119 = vmatpush3.bf16.msra.mxu0 %v398_v40 }
 0x172   :  { %1113 = vmatpush3.bf16.msra.mxu1 %v397_v42 }
 0x23a   :  { %v307_v45 = vpop.f32.mrb[4].mxu0 }
 0x23b   :  { %v316_v49 = vmul.f32 0.17677669, %v307_v45  ;;  %v263_v50 = vpop.f32.mrb[0].mxu1  ;;  %v1110_v51 = vpop.f32.mrb[5].mxu0 }
 0x23c   :  { %v314_v53 = vmul.f32 0.17677669, %v263_v50  ;;  %v1104_v54 = vpop.f32.mrb[1].mxu1  ;;  %v310_v55 = vpop.f32.mrb[6].mxu0 }
 0x23d   :  { %v324_v58 = vmul.f32 %v320_v44, %v316_v49  ;;  %v317_v59 = vmul.f32 0.17677669, %v310_v55  ;;  %v266_v60 = vpop.f32.mrb[2].mxu1  ;;  %v1111_v61 = vpop.f32.mrb[7].mxu0 }
 0x23e   :  { %v322_v62 = vmul.f32 %v318_v46, %v314_v53  ;;  %v315_v63 = vmul.f32 0.17677669, %v266_v60  ;;  %v1105_v0 = vpop.f32.mrb[3].mxu1 }
 0x23f   :  { %v325_v1 = vmul.f32 %v321_v47, %v317_v59  ;;  %v336_v2 = vsel %vm332_vm6, %v324_v58, -1e+30 }
 0x240   :  { %v323_v3 = vmul.f32 %v319_v56, %v315_v63  ;;  %v345_v4 = vsel %vm338_vm7, %v336_v2, -inf  ;;  %v334_v7 = vsel %vm330_vm8, %v322_v62, -1e+30 }
 0x241   :  { %346 = vmax.xlane.f32.xlu1 %v345_v4  ;;  %v339_v8 = vsel %vm338_vm7, %v334_v7, -inf  ;;  %v337_v11 = vsel %vm333_vm9, %v325_v1, -1e+30 }
 0x242   :  { %340 = vmax.xlane.f32.xlu0 %v339_v8  ;;  %v335_v12 = vsel %vm331_vm10, %v323_v3, -1e+30  ;;  %v348_v13 = vsel %vm338_vm7, %v337_v11, -inf }
 0x243   :  { %v342_v14 = vsel %vm338_vm7, %v335_v12, -inf }
 0x245   :  { %349 = vmax.xlane.f32.xlu1 %v348_v13 }
 0x246   :  { %343 = vmax.xlane.f32.xlu0 %v342_v14 }
 0x2ce   :  { %v347_v15 = vpop.xlane.xlu1 %346 }
 0x2cf   :  { %v353_v16 = vsub.f32 %v336_v2, %v347_v15  ;;  %v341_v17 = vpop.xlane.xlu0 %340 }
 0x2d0   :  { %v351_v18 = vsub.f32 %v334_v7, %v341_v17 }
 0x2d1   :  { %v359_v19 = vmul.f32 1.442695, %v353_v16 }
 0x2d2   :  { %v355_v20 = vmul.f32 1.442695, %v351_v18  ;;  %v350_v21 = vpop.xlane.xlu1 %349 }
 0x2d3   :  { %1168 = vpow2.f32 %v359_v19  ;;  %v354_v22 = vsub.f32 %v337_v11, %v350_v21  ;;  %v344_v23 = vpop.xlane.xlu0 %343 }
 0x2d4   :  { %1170 = vpow2.f32 %v355_v20  ;;  %v352_v24 = vsub.f32 %v335_v12, %v344_v23 }
 0x2d5   :  { %v361_v25 = vmul.f32 1.442695, %v354_v22 }
 0x2d6   :  { %v357_v26 = vmul.f32 1.442695, %v352_v24 }
 0x2d7   :  { %1172 = vpow2.f32 %v361_v25 }
 0x2d8   :  { %1174 = vpow2.f32 %v357_v26 }
 0x2dd   :  { %v1169_v27 = vpop.eup %1168 }
 0x2de   :  { %v1171_v28 = vpop.eup %1170  ;;  %v365_v32 = vsel %vm332_vm6, %v1169_v27, 0.0 }
 0x2df   :  { %v363_v29 = vsel %vm330_vm8, %v1171_v28, 0.0  ;;  %v373_v35 = vsel %vm338_vm7, %v365_v32, 0.0 }
 0x2e0   :  { %v367_v30 = vsel %vm338_vm7, %v363_v29, 0.0 }
 0x2e1   :  { %v1173_v31 = vpop.eup %1172  ;;  %368 = vadd.xlane.f32.xlu0 %v367_v30 }
 0x2e2   :  { %v1175_v33 = vpop.eup %1174  ;;  %v366_v37 = vsel %vm333_vm9, %v1173_v31, 0.0 }
 0x2e3   :  { %v364_v34 = vsel %vm331_vm10, %v1175_v33, 0.0  ;;  %v376_v38 = vsel %vm338_vm7, %v366_v37, 0.0 }
 0x2e4   :  { %v370_v36 = vsel %vm338_vm7, %v364_v34, 0.0 }
 0x2e5   :  { %374 = vadd.xlane.f32.xlu0 %v373_v35  ;;  %371 = vadd.xlane.f32.xlu1 %v370_v36 }
 0x2e9   :  { %377 = vadd.xlane.f32.xlu1 %v376_v38 }
 0x36e   :  { %v369_v39 = vpop.xlane.xlu0 %368 }
 0x36f   :  { %vm379_vm11 = vcmp.gt.f32.partialorder %v369_v39, 0.0 }
 0x370   :  { %v383_v40 = vsel %vm379_vm11, %v369_v39, 1.0 }
 0x371   :  { %1176 = vrcp.f32 %v383_v40 }
 0x372   :  { %v372_v41 = vpop.xlane.xlu1 %371  ;;  %v375_v42 = vpop.xlane.xlu0 %374 }
 0x373   :  { %vm380_vm12 = vcmp.gt.f32.partialorder %v372_v41, 0.0  ;;  %vm381_vm13 = vcmp.gt.f32.partialorder %v375_v42, 0.0 }
 0x374   :  { %v384_v43 = vsel %vm380_vm12, %v372_v41, 1.0  ;;  %v385_v44 = vsel %vm381_vm13, %v375_v42, 1.0 }
 0x375   :  { %1178 = vrcp.f32 %v384_v43 }
 0x376   :  { %v378_v45 = vpop.xlane.xlu1 %377  ;;  %1180 = vrcp.f32 %v385_v44 }
 0x377   :  { %vm382_vm14 = vcmp.gt.f32.partialorder %v378_v45, 0.0 }
 0x378   :  { %v386_v46 = vsel %vm382_vm14, %v378_v45, 1.0  ;;  %v685_v45 = vld [vmem:[#allocation11] sm:$0xff] }
 0x379   :  { %1182 = vrcp.f32 %v386_v46  ;;  %v686_v46 = vld [vmem:[#allocation11 + $0x8] sm:$0xff] }
 0x37b   :  { %v1177_v47 = vpop.eup %1176 }
 0x37c   :  { %v391_v49 = vmul.f32 %v1177_v47, %v363_v29  ;;  %v573_v47 = vld [vmem:[#allocation10] sm:$0xff] }
 0x37f   :  { %v1179_v48 = vpop.eup %1178 }
 0x380   :  { %v392_v50 = vmul.f32 %v1179_v48, %v364_v34  ;;  %v1181_v51 = vpop.eup %1180  ;;  %v689_v48 = vpack.c.bf16 %v686_v46, %v685_v45 }
 0x381   :  { %v393_v54 = vmul.f32 %v1181_v51, %v365_v32  ;;  %v688_v51 = vld [vmem:[#allocation11 + $0x18] sm:$0xff] }
 0x382   :  { %v395_v52 = vpack.c.bf16 %v392_v50, %v391_v49  ;;  %v574_v49 = vld [vmem:[#allocation10 + $0x8] sm:$0xff]  ;;  %v687_v50 = vld [vmem:[#allocation11 + $0x10] sm:$0xff]  ;;  %1132 = vmatprep.subr.bf16.mxu0 %v689_v48 }
 0x383   :  { %v1183_v53 = vpop.eup %1182 }
 0x384   :  { %v394_v55 = vmul.f32 %v1183_v53, %v366_v37  ;;  %1115 = vmatmul.mubr.msk.bf16.vlgmr.msra.gmra.mrb[4].mxu1 %vm338_vm7, %v395_v52  ;;  %v579_v52 = vpack.c.bf16 %v574_v49, %v573_v47  ;;  %v690_v53 = vpack.c.bf16 %v688_v51, %v687_v50 }
 0x386   :  { %v396_v56 = vpack.c.bf16 %v394_v55, %v393_v54  ;;  %v575_v54 = vld [vmem:[#allocation10 + $0x10] sm:$0xff]  ;;  %v576_v55 = vld [vmem:[#allocation10 + $0x18] sm:$0xff]  ;;  %1124 = vmatprep.subr.bf16.mxu1 %v579_v52 }
 0x387   :  { %1125 = vmatpush3.bf16.msra.mxu1 %v579_v52 }
 0x388   :  { %1121 = vmatmul.mubr.msk.bf16.vlgmr.msra.gmra.mrb[8].mxu0 %vm338_vm7, %v396_v56  ;;  %v580_v56 = vpack.c.bf16 %v576_v55, %v575_v54 }
 0x389   :  { %1133 = vmatpush3.bf16.msra.mxu0 %v689_v48 }
 0x38a   :  { %1134 = vmatprep.subr.bf16.mxu0 %v690_v53  ;;  %1126 = vmatprep.subr.bf16.mxu1 %v580_v56 }
 0x38b   :  { %1127 = vmatpush3.bf16.msra.mxu1 %v580_v56 }
 0x38d   :  { %1135 = vmatpush3.bf16.msra.mxu0 %v690_v53 }
 0x457   :  { %v436_v57 = vpop.f32.mrb[4].mxu1 }
 0x458   :  { %v1116_v58 = vpop.f32.mrb[5].mxu1  ;;  %v487_v59 = vsel %vm144_vm0, %v436_v57, 0.0 }
 0x459   :  { %488 = vadd.xlane.f32.xlu0 %v487_v59  ;;  %v439_v60 = vpop.f32.mrb[6].mxu1 }
 0x45a   :  { %v1117_v61 = vpop.f32.mrb[7].mxu1  ;;  %v490_v62 = vsel %vm144_vm0, %v439_v60, 0.0 }
 0x45b   :  { %v480_v63 = vpop.f32.mrb[8].mxu0  ;;  %491 = vadd.xlane.f32.xlu1 %v490_v62 }
 0x45c   :  { %v1122_v0 = vpop.f32.mrb[9].mxu0  ;;  %v493_v1 = vsel %vm144_vm0, %v480_v63, 0.0 }
 0x45d   :  { %v483_v2 = vpop.f32.mrb[10].mxu0  ;;  %494 = vadd.xlane.f32.xlu0 %v493_v1 }
 0x45e   :  { %v1123_v3 = vpop.f32.mrb[11].mxu0  ;;  %v496_v4 = vsel %vm144_vm0, %v483_v2, 0.0 }
 0x45f   :  { %497 = vadd.xlane.f32.xlu1 %v496_v4 }
 0x4e6   :  { %v489_v7 = vpop.xlane.xlu0 %488 }
 0x4e7   :  { %v500_v11 = vmul.f32 0.03125, %v489_v7 }
 0x4e8   :  { %v492_v8 = vpop.xlane.xlu1 %491 }
 0x4e9   :  { %v501_v12 = vmul.f32 0.03125, %v492_v8 }
 0x4ea   :  { %v495_v13 = vpop.xlane.xlu0 %494 }
 0x4eb   :  { %v504_v14 = vadd.f32 %v501_v12, %v500_v11  ;;  %v502_v17 = vmul.f32 0.03125, %v495_v13 }
 0x4ec   :  { %v498_v15 = vpop.xlane.xlu1 %497 }
 0x4ed   :  { %v505_v16 = vrot.slane %v504_v14, 4  ;;  %v503_v18 = vmul.f32 0.03125, %v498_v15 }
 0x4ef   :  { %v506_v19 = vadd.f32 %v505_v16, %v504_v14  ;;  %v511_v20 = vadd.f32 %v503_v18, %v502_v17 }
 0x4f1   :  { %v507_v21 = vrot.slane %v506_v19, 2  ;;  %v512_v22 = vrot.slane %v511_v20, 4 }
 0x4f3   :  { %v508_v23 = vadd.f32 %v507_v21, %v506_v19  ;;  %v513_v24 = vadd.f32 %v512_v22, %v511_v20 }
 0x4f5   :  { %v509_v25 = vrot.slane %v508_v23, 1  ;;  %v514_v26 = vrot.slane %v513_v24, 2 }
 0x4f7   :  { %v515_v27 = vadd.f32 %v514_v26, %v513_v24  ;;  %v510_v28 = vadd.f32 %v509_v25, %v508_v23 }
 0x4f9   :  { %v516_v29 = vrot.slane %v515_v27, 1  ;;  %v519_v30 = vmul.f32 0.0625, %v510_v28 }
 0x4fb   :  { %v1630_v31 = vsub.f32 %v439_v60, %v519_v30  ;;  %v1632_v32 = vsub.f32 %v436_v57, %v519_v30  ;;  %v517_v33 = vadd.f32 %v516_v29, %v515_v27 }
 0x4fd   :  { %v526_v34 = vmul.f32 %v1630_v31, %v1630_v31  ;;  %v525_v35 = vmul.f32 %v1632_v32, %v1632_v32  ;;  %v520_v36 = vmul.f32 0.0625, %v517_v33 }
 0x4ff   :  { %v532_v37 = vsel %vm144_vm0, %v526_v34, 0.0  ;;  %v529_v38 = vsel %vm144_vm0, %v525_v35, 0.0  ;;  %v1640_v39 = vsub.f32 %v483_v2, %v520_v36  ;;  %v1642_v40 = vsub.f32 %v480_v63, %v520_v36  ;;  %v851_v36 = vld [vmem:[#allocation13 + $0x10] sm:$0xff] }
 0x500   :  { %533 = vadd.xlane.f32.xlu1 %v532_v37  ;;  %530 = vadd.xlane.f32.xlu0 %v529_v38  ;;  %v852_v37 = vld [vmem:[#allocation13 + $0x18] sm:$0xff] }
 0x501   :  { %v528_v41 = vmul.f32 %v1640_v39, %v1640_v39  ;;  %v527_v42 = vmul.f32 %v1642_v40, %v1642_v40  ;;  %v856_v38 = vpack.c.bf16 %v852_v37, %v851_v36 }
 0x503   :  { %v538_v43 = vsel %vm144_vm0, %v528_v41, 0.0  ;;  %v535_v44 = vsel %vm144_vm0, %v527_v42, 0.0 }
 0x504   :  { %539 = vadd.xlane.f32.xlu1 %v538_v43  ;;  %536 = vadd.xlane.f32.xlu0 %v535_v44 }
 0x58d   :  { %v531_v57 = vpop.xlane.xlu0 %530  ;;  %v534_v58 = vpop.xlane.xlu1 %533 }
 0x58e   :  { %v541_v59 = vmul.f32 0.03125, %v531_v57  ;;  %v542_v60 = vmul.f32 0.03125, %v534_v58 }
 0x590   :  { %v545_v61 = vadd.f32 %v542_v60, %v541_v59 }
 0x591   :  { %v537_v62 = vpop.xlane.xlu0 %536  ;;  %v540_v63 = vpop.xlane.xlu1 %539 }
 0x592   :  { %v546_v0 = vrot.slane %v545_v61, 4  ;;  %v543_v1 = vmul.f32 0.03125, %v537_v62  ;;  %v544_v2 = vmul.f32 0.03125, %v540_v63 }
 0x594   :  { %v547_v3 = vadd.f32 %v546_v0, %v545_v61  ;;  %v552_v4 = vadd.f32 %v544_v2, %v543_v1 }
 0x596   :  { %v548_v7 = vrot.slane %v547_v3, 2  ;;  %v553_v8 = vrot.slane %v552_v4, 4 }
 0x598   :  { %v549_v11 = vadd.f32 %v548_v7, %v547_v3  ;;  %v554_v12 = vadd.f32 %v553_v8, %v552_v4 }
 0x59a   :  { %v550_v13 = vrot.slane %v549_v11, 1  ;;  %v555_v14 = vrot.slane %v554_v12, 2 }
 0x59c   :  { %v551_v15 = vadd.f32 %v550_v13, %v549_v11  ;;  %v556_v16 = vadd.f32 %v555_v14, %v554_v12 }
 0x59e   :  { %v559_v17 = vmul.f32 0.0625, %v551_v15  ;;  %v557_v18 = vrot.slane %v556_v16, 1 }
 0x5a0   :  { %v561_v19 = vadd.f32 1e-05, %v559_v17  ;;  %v558_v20 = vadd.f32 %v557_v18, %v556_v16 }
 0x5a2   :  { %1184 = vrsqrt.f32 %v561_v19  ;;  %v560_v21 = vmul.f32 0.0625, %v558_v20 }
 0x5a4   :  { %v562_v22 = vadd.f32 1e-05, %v560_v21 }
 0x5a6   :  { %1186 = vrsqrt.f32 %v562_v22 }
 0x5ac   :  { %v1185_v23 = vpop.eup %1184 }
 0x5ad   :  { %v565_v24 = vmul.f32 %v1185_v23, %v1632_v32  ;;  %v566_v25 = vmul.f32 %v1185_v23, %v1630_v31 }
 0x5af   :  { %v569_v26 = vadd.f32 %v565_v24, %v1581_v5  ;;  %v570_v27 = vadd.f32 %v566_v25, %v1583_v6  ;;  %v849_v5 = vld [vmem:[#allocation13] sm:$0xff]  ;;  %v850_v6 = vld [vmem:[#allocation13 + $0x8] sm:$0xff] }
 0x5b0   :  { %v1187_v28 = vpop.eup %1186  ;;  %v855_v31 = vpack.c.bf16 %v850_v6, %v849_v5 }
 0x5b1   :  { %v577_v29 = vpack.c.bf16 %v570_v27, %v569_v26  ;;  %v567_v30 = vmul.f32 %v1187_v28, %v1642_v40  ;;  %v568_v33 = vmul.f32 %v1187_v28, %v1640_v39 }
 0x5b2   :  { %1140 = vmatprep.subr.bf16.mxu1 %v855_v31 }
 0x5b3   :  { %1128 = vmatprep.mubr.msk.bf16.mxu1 %vm144_vm0, %v577_v29  ;;  %1136 = vmatprep.mubr.msk.bf16.mxu0 %vm144_vm0, %v577_v29  ;;  %v571_v34 = vadd.f32 %v567_v30, %v1588_v9  ;;  %v572_v32 = vadd.f32 %v568_v33, %v1590_v10  ;;  %v1062_v9 = vld [vmem:[%s1751_s7] ss:$0 sm:$0xff] }
 0x5b4   :  { %v1059_v10 = vld [vmem:[%s1749_s5] ss:$0 sm:$0xff] }
 0x5b5   :  { %v578_v35 = vpack.c.bf16 %v572_v32, %v571_v34 }
 0x5b7   :  { %1129 = vmatmul.mubr.msk.bf16.vlgmr.msra.gmra.mrb[8].mxu1 %vm144_vm0, %v578_v35  ;;  %1137 = vmatmul.mubr.msk.bf16.vlgmr.msra.gmra.mrb[12].mxu0 %vm144_vm0, %v578_v35 }
 0x5b8   :  { %1141 = vmatpush3.bf16.msra.mxu1 %v855_v31 }
 0x5b9   :  { %1142 = vmatprep.subr.bf16.mxu1 %v856_v38 }
 0x5bc   :  { %1143 = vmatpush3.bf16.msra.mxu1 %v856_v38 }
 0x68a   :  { %v1130_v39 = vpop.f32.mrb[8].mxu1  ;;  %v1138_v40 = vpop.f32.mrb[12].mxu0 }
 0x68b   :  { %v741_v41 = vadd.f32 %v1138_v40, %v1062_v9  ;;  %v628_v42 = vpop.f32.mrb[9].mxu1  ;;  %v732_v43 = vpop.f32.mrb[13].mxu0  ;;  %v637_v51 = vadd.f32 %v1130_v39, %v1059_v10 }
 0x68c   :  { %v629_v44 = vadd.f32 %v1059_v10, %v628_v42  ;;  %v733_v45 = vadd.f32 %v1062_v9, %v732_v43  ;;  %v1131_v46 = vpop.f32.mrb[10].mxu1  ;;  %v1139_v47 = vpop.f32.mrb[14].mxu0 }
 0x68d   :  { %v744_v48 = vadd.f32 %v1139_v47, %v1062_v9  ;;  %v631_v49 = vpop.f32.mrb[11].mxu1  ;;  %v735_v50 = vpop.f32.mrb[15].mxu0  ;;  %v756_v54 = vsel %vm144_vm0, %v741_v41, 0.0  ;;  %v640_v56 = vadd.f32 %v1131_v46, %v1059_v10  ;;  %v646_v0 = vsel %vm144_vm0, %v637_v51, 0.0 }
 0x68e   :  { %v632_v52 = vadd.f32 %v1059_v10, %v631_v49  ;;  %v736_v53 = vadd.f32 %v1062_v9, %v735_v50  ;;  %v643_v55 = vsel %vm144_vm0, %v629_v44, 0.0  ;;  %v747_v58 = vsel %vm144_vm0, %v733_v45, 0.0 }
 0x68f   :  { %v757_v57 = vsel %vm144_vm0, %v744_v48, 0.0  ;;  %v648_v4 = vsel %vm144_vm0, %v640_v56, 0.0 }
 0x690   :  { %v758_v59 = vadd.f32 %v757_v57, %v756_v54  ;;  %v644_v60 = vsel %vm144_vm0, %v632_v52, 0.0  ;;  %v748_v61 = vsel %vm144_vm0, %v736_v53, 0.0 }
 0x691   :  { %v645_v62 = vadd.f32 %v644_v60, %v643_v55  ;;  %v749_v63 = vadd.f32 %v748_v61, %v747_v58 }
 0x692   :  { %v759_v1 = vrot.slane %v758_v59, 4 }
 0x693   :  { %v647_v2 = vadd.f32 %v646_v0, %v645_v62  ;;  %v750_v3 = vrot.slane %v749_v63, 4 }
 0x694   :  { %v760_v7 = vadd.f32 %v759_v1, %v758_v59 }
 0x695   :  { %v649_v8 = vadd.f32 %v648_v4, %v647_v2  ;;  %v751_v11 = vadd.f32 %v750_v3, %v749_v63 }
 0x696   :  { %v761_v12 = vrot.slane %v760_v7, 2 }
 0x697   :  { %v650_v13 = vrot.slane %v649_v8, 4  ;;  %v752_v14 = vrot.slane %v751_v11, 2 }
 0x698   :  { %v762_v15 = vadd.f32 %v761_v12, %v760_v7 }
 0x699   :  { %v651_v16 = vadd.f32 %v650_v13, %v649_v8  ;;  %v753_v17 = vadd.f32 %v752_v14, %v751_v11 }
 0x69a   :  { %v763_v18 = vrot.slane %v762_v15, 1 }
 0x69b   :  { %v652_v19 = vrot.slane %v651_v16, 2  ;;  %v754_v20 = vrot.slane %v753_v17, 1 }
 0x69c   :  { %v764_v21 = vadd.f32 %v763_v18, %v762_v15 }
 0x69d   :  { %v653_v22 = vadd.f32 %v652_v19, %v651_v16  ;;  %v755_v23 = vadd.f32 %v754_v20, %v753_v17 }
 0x69e   :  { %v766_v24 = vmul.f32 0.0625, %v764_v21 }
 0x69f   :  { %v654_v25 = vrot.slane %v653_v22, 1  ;;  %v765_v26 = vmul.f32 0.0625, %v755_v23 }
 0x6a0   :  { %v769_v27 = vsub.f32 %v741_v41, %v766_v24  ;;  %v770_v28 = vsub.f32 %v744_v48, %v766_v24 }
 0x6a1   :  { %v655_v29 = vadd.f32 %v654_v25, %v653_v22  ;;  %v767_v30 = vsub.f32 %v733_v45, %v765_v26  ;;  %v768_v33 = vsub.f32 %v736_v53, %v765_v26 }
 0x6a2   :  { %v773_v34 = vmul.f32 %v769_v27, %v769_v27  ;;  %v774_v32 = vmul.f32 %v770_v28, %v770_v28 }
 0x6a3   :  { %v656_v35 = vmul.f32 0.03125, %v655_v29  ;;  %v771_v5 = vmul.f32 %v767_v30, %v767_v30  ;;  %v772_v6 = vmul.f32 %v768_v33, %v768_v33 }
 0x6a4   :  { %v784_v31 = vsel %vm144_vm0, %v773_v34, 0.0  ;;  %v785_v36 = vsel %vm144_vm0, %v774_v32, 0.0 }
 0x6a5   :  { %v786_v37 = vadd.f32 %v785_v36, %v784_v31  ;;  %v657_v38 = vsub.f32 %v629_v44, %v656_v35  ;;  %v658_v9 = vsub.f32 %v632_v52, %v656_v35  ;;  %v659_v10 = vsub.f32 %v637_v51, %v656_v35 }
 0x6a6   :  { %v660_v39 = vsub.f32 %v640_v56, %v656_v35  ;;  %v775_v40 = vsel %vm144_vm0, %v771_v5, 0.0  ;;  %v776_v41 = vsel %vm144_vm0, %v772_v6, 0.0 }
 0x6a7   :  { %v787_v42 = vrot.slane %v786_v37, 4  ;;  %v661_v43 = vmul.f32 %v657_v38, %v657_v38  ;;  %v662_v45 = vmul.f32 %v658_v9, %v658_v9  ;;  %v663_v46 = vmul.f32 %v659_v10, %v659_v10 }
 0x6a8   :  { %v777_v47 = vadd.f32 %v776_v41, %v775_v40  ;;  %v664_v49 = vmul.f32 %v660_v39, %v660_v39 }
 0x6a9   :  { %v788_v48 = vadd.f32 %v787_v42, %v786_v37  ;;  %v665_v50 = vsel %vm144_vm0, %v661_v43, 0.0  ;;  %v666_v53 = vsel %vm144_vm0, %v662_v45, 0.0  ;;  %v668_v51 = vsel %vm144_vm0, %v663_v46, 0.0 }
 0x6aa   :  { %v667_v54 = vadd.f32 %v666_v53, %v665_v50  ;;  %v778_v44 = vrot.slane %v777_v47, 4  ;;  %v670_v58 = vsel %vm144_vm0, %v664_v49, 0.0 }
 0x6ab   :  { %v789_v52 = vrot.slane %v788_v48, 2 }
 0x6ac   :  { %v669_v55 = vadd.f32 %v668_v51, %v667_v54  ;;  %v779_v56 = vadd.f32 %v778_v44, %v777_v47 }
 0x6ad   :  { %v790_v57 = vadd.f32 %v789_v52, %v788_v48 }
 0x6ae   :  { %v671_v59 = vadd.f32 %v670_v58, %v669_v55  ;;  %v780_v60 = vrot.slane %v779_v56, 2 }
 0x6af   :  { %v791_v61 = vrot.slane %v790_v57, 1 }
 0x6b0   :  { %v672_v62 = vrot.slane %v671_v59, 4  ;;  %v781_v63 = vadd.f32 %v780_v60, %v779_v56 }
 0x6b1   :  { %v792_v0 = vadd.f32 %v791_v61, %v790_v57 }
 0x6b2   :  { %v673_v1 = vadd.f32 %v672_v62, %v671_v59  ;;  %v782_v2 = vrot.slane %v781_v63, 1 }
 0x6b3   :  { %v794_v3 = vmul.f32 0.0625, %v792_v0 }
 0x6b4   :  { %v674_v4 = vrot.slane %v673_v1, 2  ;;  %v783_v7 = vadd.f32 %v782_v2, %v781_v63 }
 0x6b5   :  { %v796_v8 = vadd.f32 1e-05, %v794_v3 }
 0x6b6   :  { %v675_v11 = vadd.f32 %v674_v4, %v673_v1  ;;  %v793_v12 = vmul.f32 0.0625, %v783_v7 }
 0x6b7   :  { %1188 = vrsqrt.f32 %v796_v8 }
 0x6b8   :  { %v676_v13 = vrot.slane %v675_v11, 1  ;;  %v795_v14 = vadd.f32 1e-05, %v793_v12 }
 0x6ba   :  { %v677_v15 = vadd.f32 %v676_v13, %v675_v11  ;;  %1190 = vrsqrt.f32 %v795_v14  ;;  %v1065_v13 = vld [vmem:[%s1753_s9] ss:$0 sm:$0xff]  ;;  %s1399_s9 = smov [#allocation14]  }
 0x6bb   :  { %s1034_s18 = sshll.u32 %s1399_s9, 4  ;;  %s1035_s18 = int_to_ptr.vmem [resolvable:$true] %s1034_s18 }
 0x6bc   :  { %v678_v16 = vmul.f32 0.03125, %v677_v15  ;;  %s1356_s1 = scalar_lea.vmem %s1035_s18, 512  ;;  %p1361_p1 = scmp.lt.s32.totalorder %s1035_s18, %s1035_s18 }
 0x6bd   :  { %p1357_p0 = scmp.ne.s32.totalorder %s1035_s18, %s1356_s1  ;;  %p1362_p2 = scmp.lt.s32.totalorder %s1356_s1, %s1356_s1 }
 0x6be   :  { %v679_v17 = vadd.f32 1e-05, %v678_v16 }
 0x6bf   :  { %p1363_p3 = por %p1362_p2, %p1361_p1 }
 0x6c0   :  { %1192 = vrsqrt.f32 %v679_v17 }
 0x6c1   :  { %v1189_v18 = vpop.eup %1188  ;;  %p1364_p4 = pnand %p1363_p3, %p1357_p0 }
 0x6c2   :  { %v801_v19 = vmul.f32 %v1189_v18, %v769_v27  ;;  %v802_v20 = vmul.f32 %v1189_v18, %v770_v28 }
 0x6c4   :  { %v1191_v21 = vpop.eup %1190  ;;  %v806_v29 = vsel %vm144_vm0, %v801_v19, 0.0  ;;  %v808_v32 = vsel %vm144_vm0, %v802_v20, 0.0 }
 0x6c5   :  { %v799_v22 = vmul.f32 %v1191_v21, %v767_v30  ;;  %v800_v23 = vmul.f32 %v1191_v21, %v768_v33 }
 0x6c7   :  { %v803_v24 = vsel %vm144_vm0, %v799_v22, 0.0  ;;  %v804_v25 = vsel %vm144_vm0, %v800_v23, 0.0 }
 0x6c8   :  { %v805_v26 = vadd.f32 %v804_v25, %v803_v24 }
 0x6ca   :  { %v1193_v34 = vpop.eup %1192  ;;  %v807_v35 = vadd.f32 %v806_v29, %v805_v26 }
 0x6cb   :  { %v1688_v5 = vmul.f32 %v1193_v34, %v657_v38  ;;  %v1690_v6 = vmul.f32 %v1193_v34, %v658_v9  ;;  %v1692_v27 = vmul.f32 %v1193_v34, %v659_v10  ;;  %v1694_v28 = vmul.f32 %v1193_v34, %v660_v39 }
 0x6cc   :  { %v809_v30 = vadd.f32 %v808_v32, %v807_v35 }
 0x6ce   :  { %v810_v33 = vrot.slane %v809_v30, 4 }
 0x6d0   :  { %v811_v31 = vadd.f32 %v810_v33, %v809_v30 }
 0x6d2   :  { %v812_v36 = vrot.slane %v811_v31, 2 }
 0x6d4   :  { %v813_v37 = vadd.f32 %v812_v36, %v811_v31 }
 0x6d6   :  { %v814_v40 = vrot.slane %v813_v37, 1 }
 0x6d8   :  { %v815_v41 = vadd.f32 %v814_v40, %v813_v37 }
 0x6da   :  { %v816_v42 = vmul.f32 0.03125, %v815_v41 }
 0x6dc   :  { %v817_v43 = vsub.f32 %v799_v22, %v816_v42  ;;  %v818_v45 = vsub.f32 %v800_v23, %v816_v42  ;;  %v819_v46 = vsub.f32 %v801_v19, %v816_v42  ;;  %v820_v47 = vsub.f32 %v802_v20, %v816_v42 }
 0x6de   :  { %v821_v38 = vmul.f32 %v817_v43, %v817_v43  ;;  %v822_v48 = vmul.f32 %v818_v45, %v818_v45  ;;  %v823_v9 = vmul.f32 %v819_v46, %v819_v46  ;;  %v824_v49 = vmul.f32 %v820_v47, %v820_v47 }
 0x6e0   :  { %v825_v10 = vsel %vm144_vm0, %v821_v38, 0.0  ;;  %v826_v39 = vsel %vm144_vm0, %v822_v48, 0.0  ;;  %v828_v53 = vsel %vm144_vm0, %v823_v9, 0.0  ;;  %v830_v44 = vsel %vm144_vm0, %v824_v49, 0.0 }
 0x6e1   :  { %v827_v50 = vadd.f32 %v826_v39, %v825_v10 }
 0x6e3   :  { %v829_v54 = vadd.f32 %v828_v53, %v827_v50 }
 0x6e5   :  { %v831_v52 = vadd.f32 %v830_v44, %v829_v54 }
 0x6e7   :  { %v832_v51 = vrot.slane %v831_v52, 4 }
 0x6e9   :  { %v833_v55 = vadd.f32 %v832_v51, %v831_v52 }
 0x6eb   :  { %v834_v56 = vrot.slane %v833_v55, 2 }
 0x6ed   :  { %v835_v57 = vadd.f32 %v834_v56, %v833_v55 }
 0x6ef   :  { %v836_v58 = vrot.slane %v835_v57, 1 }
 0x6f1   :  { %v837_v59 = vadd.f32 %v836_v58, %v835_v57 }
 0x6f3   :  { %v838_v60 = vmul.f32 0.03125, %v837_v59 }
 0x6f5   :  { %v839_v61 = vadd.f32 1e-05, %v838_v60 }
 0x6f7   :  { %1194 = vrsqrt.f32 %v839_v61 }
 0x701   :  { %v1195_v62 = vpop.eup %1194 }
 0x702   :  { %v842_v63 = vmul.f32 %v1195_v62, %v818_v45  ;;  %v841_v0 = vmul.f32 %v1195_v62, %v817_v43  ;;  %v843_v1 = vmul.f32 %v1195_v62, %v819_v46  ;;  %v844_v2 = vmul.f32 %v1195_v62, %v820_v47 }
 0x704   :  { %v846_v3 = vmax.f32 %v842_v63, 0.0  ;;  %v845_v4 = vmax.f32 %v841_v0, 0.0  ;;  %v847_v7 = vmax.f32 %v843_v1, 0.0  ;;  %v848_v8 = vmax.f32 %v844_v2, 0.0 }
 0x706   :  { %v853_v11 = vpack.c.bf16 %v846_v3, %v845_v4  ;;  %v854_v12 = vpack.c.bf16 %v848_v8, %v847_v7 }
 0x708   :  { %1144 = vmatprep.mubr.msk.bf16.mxu1 %vm144_vm0, %v853_v11 }
 0x709   :  { %1145 = vmatmul.mubr.msk.bf16.vlgmr.msra.gmra.mrb[12].mxu1 %vm144_vm0, %v854_v12 }
 0x7dc   :  { %v1146_v14 = vpop.f32.mrb[12].mxu1 }
 0x7dd   :  { %v913_v15 = vadd.f32 %v1146_v14, %v1065_v13  ;;  %v904_v16 = vpop.f32.mrb[13].mxu1 }
 0x7de   :  { %v905_v17 = vadd.f32 %v1065_v13, %v904_v16  ;;  %v1147_v18 = vpop.f32.mrb[14].mxu1 }
 0x7df   :  { %v916_v19 = vadd.f32 %v1147_v18, %v1065_v13  ;;  %v907_v20 = vpop.f32.mrb[15].mxu1  ;;  %v928_v22 = vsel %vm144_vm0, %v913_v15, 0.0 }
 0x7e0   :  { %v908_v21 = vadd.f32 %v1065_v13, %v907_v20  ;;  %v919_v24 = vsel %vm144_vm0, %v905_v17, 0.0 }
 0x7e1   :  { %v929_v23 = vsel %vm144_vm0, %v916_v19, 0.0 }
 0x7e2   :  { %v930_v25 = vadd.f32 %v929_v23, %v928_v22  ;;  %v920_v26 = vsel %vm144_vm0, %v908_v21, 0.0 }
 0x7e3   :  { %v921_v29 = vadd.f32 %v920_v26, %v919_v24 }
 0x7e4   :  { %v931_v34 = vrot.slane %v930_v25, 4 }
 0x7e5   :  { %v922_v32 = vrot.slane %v921_v29, 4 }
 0x7e6   :  { %v932_v35 = vadd.f32 %v931_v34, %v930_v25 }
 0x7e7   :  { %v923_v30 = vadd.f32 %v922_v32, %v921_v29 }
 0x7e8   :  { %v933_v33 = vrot.slane %v932_v35, 2 }
 0x7e9   :  { %v924_v31 = vrot.slane %v923_v30, 2 }
 0x7ea   :  { %v934_v36 = vadd.f32 %v933_v33, %v932_v35 }
 0x7eb   :  { %v925_v37 = vadd.f32 %v924_v31, %v923_v30 }
 0x7ec   :  { %v935_v40 = vrot.slane %v934_v36, 1 }
 0x7ed   :  { %v926_v41 = vrot.slane %v925_v37, 1 }
 0x7ee   :  { %v936_v42 = vadd.f32 %v935_v40, %v934_v36 }
 0x7ef   :  { %v927_v43 = vadd.f32 %v926_v41, %v925_v37 }
 0x7f0   :  { %v938_v45 = vmul.f32 0.0625, %v936_v42 }
 0x7f1   :  { %v937_v46 = vmul.f32 0.0625, %v927_v43 }
 0x7f2   :  { %v941_v47 = vsub.f32 %v913_v15, %v938_v45  ;;  %v942_v38 = vsub.f32 %v916_v19, %v938_v45 }
 0x7f3   :  { %v939_v48 = vsub.f32 %v905_v17, %v937_v46  ;;  %v940_v9 = vsub.f32 %v908_v21, %v937_v46 }
 0x7f4   :  { %v945_v49 = vmul.f32 %v941_v47, %v941_v47  ;;  %v946_v10 = vmul.f32 %v942_v38, %v942_v38 }
 0x7f5   :  { %v943_v39 = vmul.f32 %v939_v48, %v939_v48  ;;  %v944_v50 = vmul.f32 %v940_v9, %v940_v9 }
 0x7f6   :  { %v956_v53 = vsel %vm144_vm0, %v945_v49, 0.0  ;;  %v957_v54 = vsel %vm144_vm0, %v946_v10, 0.0 }
 0x7f7   :  { %v958_v44 = vadd.f32 %v957_v54, %v956_v53  ;;  %v947_v52 = vsel %vm144_vm0, %v943_v39, 0.0  ;;  %v948_v51 = vsel %vm144_vm0, %v944_v50, 0.0 }
 0x7f8   :  { %v949_v55 = vadd.f32 %v948_v51, %v947_v52 }
 0x7f9   :  { %v959_v56 = vrot.slane %v958_v44, 4 }
 0x7fa   :  { %v950_v57 = vrot.slane %v949_v55, 4 }
 0x7fb   :  { %v960_v58 = vadd.f32 %v959_v56, %v958_v44 }
 0x7fc   :  { %v951_v59 = vadd.f32 %v950_v57, %v949_v55 }
 0x7fd   :  { %v961_v60 = vrot.slane %v960_v58, 2 }
 0x7fe   :  { %v952_v61 = vrot.slane %v951_v59, 2 }
 0x7ff   :  { %v962_v62 = vadd.f32 %v961_v60, %v960_v58 }
 0x800   :  { %v953_v63 = vadd.f32 %v952_v61, %v951_v59 }
 0x801   :  { %v963_v0 = vrot.slane %v962_v62, 1 }
 0x802   :  { %v954_v1 = vrot.slane %v953_v63, 1 }
 0x803   :  { %v964_v2 = vadd.f32 %v963_v0, %v962_v62 }
 0x804   :  { %v955_v3 = vadd.f32 %v954_v1, %v953_v63 }
 0x805   :  { %v966_v4 = vmul.f32 0.0625, %v964_v2 }
 0x806   :  { %v965_v7 = vmul.f32 0.0625, %v955_v3 }
 0x807   :  { %v968_v8 = vadd.f32 1e-05, %v966_v4 }
 0x808   :  { %v967_v11 = vadd.f32 1e-05, %v965_v7 }
 0x809   :  { %1196 = vrsqrt.f32 %v968_v8 }
 0x80a   :  { %1198 = vrsqrt.f32 %v967_v11 }
 0x813   :  { %v1197_v12 = vpop.eup %1196 }
 0x814   :  { %v1199_v13 = vpop.eup %1198  ;;  %v973_v14 = vmul.f32 %v1197_v12, %v941_v47  ;;  %v974_v15 = vmul.f32 %v1197_v12, %v942_v38 }
 0x815   :  { %v971_v16 = vmul.f32 %v1199_v13, %v939_v48  ;;  %v972_v17 = vmul.f32 %v1199_v13, %v940_v9 }
 0x816   :  { %v978_v21 = vsel %vm144_vm0, %v973_v14, 0.0  ;;  %v980_v23 = vsel %vm144_vm0, %v974_v15, 0.0 }
 0x817   :  { %v975_v18 = vsel %vm144_vm0, %v971_v16, 0.0  ;;  %v976_v19 = vsel %vm144_vm0, %v972_v17, 0.0 }
 0x818   :  { %v977_v20 = vadd.f32 %v976_v19, %v975_v18 }
 0x81a   :  { %v979_v22 = vadd.f32 %v978_v21, %v977_v20 }
 0x81c   :  { %v981_v24 = vadd.f32 %v980_v23, %v979_v22 }
 0x81e   :  { %v982_v25 = vrot.slane %v981_v24, 4 }
 0x820   :  { %v983_v26 = vadd.f32 %v982_v25, %v981_v24 }
 0x822   :  { %v984_v29 = vrot.slane %v983_v26, 2 }
 0x824   :  { %v985_v34 = vadd.f32 %v984_v29, %v983_v26 }
 0x826   :  { %v986_v32 = vrot.slane %v985_v34, 1 }
 0x828   :  { %v987_v35 = vadd.f32 %v986_v32, %v985_v34 }
 0x82a   :  { %v988_v30 = vmul.f32 0.03125, %v987_v35 }
 0x82c   :  { %v989_v33 = vsub.f32 %v971_v16, %v988_v30  ;;  %v990_v31 = vsub.f32 %v972_v17, %v988_v30  ;;  %v991_v36 = vsub.f32 %v973_v14, %v988_v30  ;;  %v992_v37 = vsub.f32 %v974_v15, %v988_v30 }
 0x82e   :  { %v993_v40 = vmul.f32 %v989_v33, %v989_v33  ;;  %v994_v41 = vmul.f32 %v990_v31, %v990_v31  ;;  %v995_v42 = vmul.f32 %v991_v36, %v991_v36  ;;  %v996_v43 = vmul.f32 %v992_v37, %v992_v37 }
 0x830   :  { %v997_v45 = vsel %vm144_vm0, %v993_v40, 0.0  ;;  %v998_v46 = vsel %vm144_vm0, %v994_v41, 0.0  ;;  %v1000_v38 = vsel %vm144_vm0, %v995_v42, 0.0  ;;  %v1002_v9 = vsel %vm144_vm0, %v996_v43, 0.0 }
 0x831   :  { %v999_v47 = vadd.f32 %v998_v46, %v997_v45 }
 0x833   :  { %v1001_v48 = vadd.f32 %v1000_v38, %v999_v47 }
 0x835   :  { %v1003_v49 = vadd.f32 %v1002_v9, %v1001_v48 }
 0x837   :  { %v1004_v10 = vrot.slane %v1003_v49, 4 }
 0x839   :  { %v1005_v39 = vadd.f32 %v1004_v10, %v1003_v49 }
 0x83b   :  { %v1006_v50 = vrot.slane %v1005_v39, 2 }
 0x83d   :  { %v1007_v53 = vadd.f32 %v1006_v50, %v1005_v39 }
 0x83f   :  { %v1008_v54 = vrot.slane %v1007_v53, 1 }
 0x841   :  { %v1009_v44 = vadd.f32 %v1008_v54, %v1007_v53 }
 0x843   :  { %v1010_v52 = vmul.f32 0.03125, %v1009_v44 }
 0x845   :  { %v1011_v51 = vadd.f32 1e-05, %v1010_v52 }
 0x847   :  { %1200 = vrsqrt.f32 %v1011_v51 }
 0x851   :  { %v1201_v55 = vpop.eup %1200 }
 0x852   :  { %v1013_v56 = vmul.f32 %v1201_v55, %v989_v33  ;;  %v1014_v57 = vmul.f32 %v1201_v55, %v990_v31  ;;  %v1015_v58 = vmul.f32 %v1201_v55, %v991_v36  ;;  %v1016_v59 = vmul.f32 %v1201_v55, %v992_v37 }
 0x854   :  { %v1018_v60 = vadd.f32 %v1014_v57, %v1690_v6  ;;  %v1017_v61 = vadd.f32 %v1013_v56, %v1688_v5  ;;  %v1019_v62 = vadd.f32 %v1015_v58, %v1692_v27  ;;  %v1020_v63 = vadd.f32 %v1016_v59, %v1694_v28 }
 0x856   :  { %v1022_v0 = vmax.f32 %v1018_v60, 0.0  ;;  %v1021_v1 = vmax.f32 %v1017_v61, 0.0  ;;  %v1023_v2 = vmax.f32 %v1019_v62, 0.0  ;;  %v1024_v3 = vmax.f32 %v1020_v63, 0.0 }
 0x858   :  { %1026 = vst.msk [vmem:[#allocation14 + $0x8] sm:$0xff] %vm144_vm0, %v1022_v0  ;;  %1025 = vst.msk [vmem:[#allocation14] sm:$0xff] %vm144_vm0, %v1021_v1 }
 0x859   :  { %1027 = vst.msk [vmem:[#allocation14 + $0x10] sm:$0xff] %vm144_vm0, %v1023_v2  ;;  %1028 = vst.msk [vmem:[#allocation14 + $0x18] sm:$0xff] %vm144_vm0, %v1024_v3 }
 0x85a   :  { %1367 = shalt.err (!%p1364_p4)
}
 0x85b   :  { %s1368_s21 = scalar_lea.hbm %s1754_s10, 512 }
 0x85c   :  { %p1369_p5 = scmp.ne.s32.totalorder %s1754_s10, %s1368_s21  ;;  %p1372_p6 = scmp.lt.u32.totalorder %s1368_s21, %s1754_s10 }
 0x85e   :  { %p1374_p7 = pnand %p1372_p6, %p1369_p5 }
 0x860   :  { %1377 = shalt.err (!%p1374_p7)
}
 0x861   :  { %1040 = dma.vmem_to_hbm [thread:$0]  %s1035_s18, 512, %s1754_s10, [#allocation4], %s1390_s25, %s1390_s25, %s1391_s26  }
 0x862   :  { %1386 = dma.done.wait [#allocation4], 512  }
 0x863   :  { %1387 = vsyncadd [#allocation4], 4294966784 }
 0x864   :  { %1044 = vsyncpa [#allocation3], 1 }
 0x865   :  { %1045 = vsyncpa [#allocation6], 1 }
 0x866   :  { %1046 = vsyncpa [#allocation9], 1 }
 0x867   :  { %1047 = vsyncpa [#allocation12], 1 }
 0x868   :  { %1048 = vsyncpa [#allocation4], 1 }

</bundles_post_ra>
